<compile_context>
chip_gen: v5e
topology: v5e:2x2
jax: 0.10.0
libtpu: 0.0.40
codegen_flags: <defaults>
</compile_context>

<pallas_src>
import jax
import jax.numpy as jnp
from jax.experimental import pallas as pl
from jax.experimental.pallas import tpu as pltpu

P_DROP = 0.5
INV_KEEP = 1.0 / (1.0 - P_DROP)  # = 2.0 (inverted dropout scale)


# ---------------------------------------------------------------------------
# In-kernel counter-based PRNG (pure int32 ops -> lowers on TPU and interpret)
# ---------------------------------------------------------------------------
def _lsr(x, k):
    """Logical shift-right on int32 (arithmetic shift + mask of high bits)."""
    return (x >> k) & jnp.int32((1 << (32 - k)) - 1)


def _lowbias32(x):
    """Chris Wellons' lowbias32 integer hash; int32 arithmetic wraps mod 2^32."""
    x = x ^ _lsr(x, 16)
    x = x * jnp.int32(0x7FEB352D)
    x = x ^ _lsr(x, 15)
    x = x * jnp.int32(-2073254261)  # 0x846CA68B reinterpreted as int32
    x = x ^ _lsr(x, 16)
    return x


def _dropout_keep_mask(seed, layer, shape, row0):
    """Boolean keep-mask, P(keep) = 0.5 exactly (sign-bit test on hashed bits)."""
    rows = jax.lax.broadcasted_iota(jnp.int32, shape, 0) + row0
    cols = jax.lax.broadcasted_iota(jnp.int32, shape, 1)
    ctr = rows * jnp.int32(shape[1]) + cols
    ctr = ctr + seed + jnp.int32(((layer + 1) * 0x3243F6A9) & 0x7FFFFFFF)
    bits = _lowbias32(ctr)
    return bits >= 0  # top bit clear -> keep (probability exactly 1/2)


def _softplus(v):
    """Numerically stable softplus using only exp/log (safe Mosaic lowering)."""
    return jnp.maximum(v, 0.0) + jnp.log(1.0 + jnp.exp(-jnp.abs(v)))


def _sigmoid(v):
    return 1.0 / (1.0 + jnp.exp(-v))


# ---------------------------------------------------------------------------
# Kernel
# ---------------------------------------------------------------------------
def _make_kernel(num_hidden, task, tm):
    """Kernel over one M-tile (tm rows of stacked MC samples x batch)."""

    def kernel(seed_ref, x_ref, *refs):
        if task == "regression":
            n_wb = 2 * num_hidden + 4  # hidden (w,b)* + (w_mean,b_mean,w_var,b_var)
            mean_ref, var_ref = refs[n_wb:]
        else:
            n_wb = 2 * num_hidden + 2  # hidden (w,b)* + (w_out,b_out)
            (prob_ref,) = refs[n_wb:]
        wb = refs[:n_wb]

        seed = seed_ref[0]
        row0 = pl.program_id(0) * tm  # global row offset of this tile
        x = x_ref[...]

        # Hidden layers: Linear -> dropout(p=0.5, training=True) -> ReLU
        # (dropout + ReLU fused: max(h*m*2, 0) == where(m, max(h,0)*2, 0))
        for l in range(num_hidden):
            w = wb[2 * l][...]
            b = wb[2 * l + 1][...]  # (1, out) broadcast bias
            h = jnp.dot(x, w, preferred_element_type=jnp.float32) + b
            keep = _dropout_keep_mask(seed, l, h.shape, row0)
            x = jnp.where(keep,
                          jnp.maximum(h, 0.0) * jnp.float32(INV_KEEP),
                          jnp.float32(0.0))

        if task == "regression":
            wm = wb[2 * num_hidden][...]
            bm = wb[2 * num_hidden + 1][...]
            wv = wb[2 * num_hidden + 2][...]
            bv = wb[2 * num_hidden + 3][...]
            mean_ref[...] = jnp.dot(x, wm, preferred_element_type=jnp.float32) + bm
            v = jnp.dot(x, wv, preferred_element_type=jnp.float32) + bv
            var_ref[...] = _softplus(v) + jnp.float32(1e-6)
        else:  # classification
            wo = wb[2 * num_hidden][...]
            bo = wb[2 * num_hidden + 1][...]
            logits = jnp.dot(x, wo, preferred_element_type=jnp.float32) + bo
            prob_ref[...] = _sigmoid(logits)

    return kernel


# ---------------------------------------------------------------------------
# Wrapper
# ---------------------------------------------------------------------------
def _choose_tile(m):
    for t in (512, 256, 128, 64, 32, 16, 8):
        if m % t == 0:
            return t
    return m  # tiny M: single full-extent block


def network_forward(x, params, output_dim, task, seed, num_samples=1):
    """Run `num_samples` MC-dropout forward passes of the network in ONE kernel.

    x:      (batch, input_dim) float32
    params: list of (W [in, out], b [out]); last layer maps to 2*output_dim
            (regression) or output_dim (classification).
    Returns per-sample outputs with a leading num_samples axis:
      regression:     (mean, variance), each (num_samples, batch, output_dim)
      classification: prob, (num_samples, batch, output_dim)
    """
    num_hidden = len(params) - 1
    batch, in_dim = x.shape
    m = num_samples * batch
    tm = _choose_tile(m)
    grid = (m // tm,)

    # Stack MC samples into the M dimension (same input replicated per sample;
    # the dropout masks differ per global row, so samples are independent).
    x_rep = jnp.tile(x.astype(jnp.float32), (num_samples, 1))

    flat_args = [jnp.asarray([seed], dtype=jnp.int32), x_rep]
    in_specs = [
        pl.BlockSpec(memory_space=pltpu.MemorySpace.SMEM),  # seed scalar
        pl.BlockSpec((tm, in_dim), lambda i: (i, 0)),       # activation tile
    ]

    def resident(shape):
        # Full array, same block every grid step -> stays resident in VMEM.
        return pl.BlockSpec(shape, lambda i: tuple(0 for _ in shape))

    for (w, b) in params[:-1]:
        flat_args += [w.astype(jnp.float32), b.reshape(1, -1).astype(jnp.float32)]
        in_specs += [resident(w.shape), resident((1, b.shape[-1]))]

    w_last = params[-1][0].astype(jnp.float32)
    b_last = params[-1][1].astype(jnp.float32)

    if task == "regression":
        # Split the head outside the kernel -> no lane-offset slices in-kernel.
        wm, wv = w_last[:, :output_dim], w_last[:, output_dim:]
        bm, bv = b_last[:output_dim].reshape(1, -1), b_last[output_dim:].reshape(1, -1)
        flat_args += [wm, bm, wv, bv]
        in_specs += [resident(wm.shape), resident(bm.shape),
                     resident(wv.shape), resident(bv.shape)]
        out_shape = (jax.ShapeDtypeStruct((m, output_dim), jnp.float32),
                     jax.ShapeDtypeStruct((m, output_dim), jnp.float32))
        out_specs = (pl.BlockSpec((tm, output_dim), lambda i: (i, 0)),
                     pl.BlockSpec((tm, output_dim), lambda i: (i, 0)))
    else:
        flat_args += [w_last, b_last.reshape(1, -1)]
        in_specs += [resident(w_last.shape), resident((1, b_last.shape[-1]))]
        out_shape = jax.ShapeDtypeStruct((m, output_dim), jnp.float32)
        out_specs = pl.BlockSpec((tm, output_dim), lambda i: (i, 0))

    kernel = _make_kernel(num_hidden, task, tm)

    # MC-sample/batch axis is embarrassingly parallel: shard across the two
    # TensorCores on v7x.  Only pass TPU compiler params when actually on TPU
    # so CPU/interpret runs stay clean.
    compiler_params = None
    if jax.devices()[0].platform == "tpu":
        compiler_params = pltpu.CompilerParams(dimension_semantics=("parallel",))

    out = pl.pallas_call(
        kernel,
        out_shape=out_shape,
        grid=grid,
        in_specs=in_specs,
        out_specs=out_specs,
        compiler_params=compiler_params,
    )(*flat_args)

    if task == "regression":
        mean, var = out
        return (mean.reshape(num_samples, batch, output_dim),
                var.reshape(num_samples, batch, output_dim))
    return out.reshape(num_samples, batch, output_dim)


def init_params(key, input_dim, net_arch, output_dim, task):
    """PyTorch Linear default init: U(-1/sqrt(fan_in), 1/sqrt(fan_in))."""
    last_out = 2 * output_dim if task == "regression" else output_dim
    out_dims = list(net_arch) + [last_out]
    params = []
    in_f = input_dim
    for out_f in out_dims:
        key, kw, kb = jax.random.split(key, 3)
        bound = 1.0 / float(in_f) ** 0.5
        w = jax.random.uniform(kw, (in_f, out_f), jnp.float32, -bound, bound)
        b = jax.random.uniform(kb, (out_f,), jnp.float32, -bound, bound)
        params.append((w, b))
        in_f = out_f
    return params


if __name__ == "__main__":
    key = jax.random.PRNGKey(0)
    batch = 8
    input_dim = 16
    net_arch = [32, 32]
    output_dim = 2
    num_samples = 32  # MC-dropout samples folded into one kernel call (M = 256)

    kx, kp = jax.random.split(key)
    x = jax.random.normal(kx, (batch, input_dim), jnp.float32)

    # Regression branch
    params = init_params(kp, input_dim, net_arch, output_dim, "regression")
    mean, variance = network_forward(x, params, output_dim, "regression",
                                     seed=1234, num_samples=num_samples)
    jax.block_until_ready((mean, variance))
    assert mean.shape == (num_samples, batch, output_dim)
    assert variance.shape == (num_samples, batch, output_dim)
    assert bool(jnp.all(variance > 0.0))              # softplus(.) + 1e-6 > 0
    assert bool(jnp.all(jnp.isfinite(mean)))
    assert bool(jnp.all(jnp.isfinite(variance)))
    assert bool(jnp.any(mean[0] != mean[1]))          # distinct masks per sample

    # Classification branch
    cls_params = init_params(kp, input_dim, net_arch, output_dim, "classification")
    prob = network_forward(x, cls_params, output_dim, "classification",
                           seed=7, num_samples=num_samples)
    jax.block_until_ready(prob)
    assert prob.shape == (num_samples, batch, output_dim)
    assert bool(jnp.all((prob >= 0.0) & (prob <= 1.0)))

    print("KERNEL_OK")
</pallas_src>

<mosaic_0001>
module attributes {stable_mosaic.version = 11 : i64} {
  func.func @kernel(%arg0: i32, %arg1: memref<1xi32, #tpu.memory_space<smem>>, %arg2: memref<256x16xf32, #tpu.memory_space<vmem>>, %arg3: memref<16x32xf32, #tpu.memory_space<vmem>>, %arg4: memref<1x32xf32, #tpu.memory_space<vmem>>, %arg5: memref<32x32xf32, #tpu.memory_space<vmem>>, %arg6: memref<1x32xf32, #tpu.memory_space<vmem>>, %arg7: memref<32x2xf32, #tpu.memory_space<vmem>>, %arg8: memref<1x2xf32, #tpu.memory_space<vmem>>, %arg9: memref<32x2xf32, #tpu.memory_space<vmem>>, %arg10: memref<1x2xf32, #tpu.memory_space<vmem>>, %arg11: memref<256x2xf32, #tpu.memory_space<vmem>>, %arg12: memref<256x2xf32, #tpu.memory_space<vmem>>) attributes {dimension_semantics = [#tpu.dimension_semantics<arbitrary>], iteration_bounds = array<i64: 1>, scalar_prefetch = 0 : i64, scratch_operands = 0 : i64, tpu.core_type = #tpu.core_type<tc>, window_params = [{transform_indices = @transform_0, window_bounds = array<i64: 1>}, {transform_indices = @transform_1, window_bounds = array<i64: 256, 16>}, {pipeline_mode = #tpu.pipeline_mode<synchronous>, transform_indices = @transform_2, window_bounds = array<i64: 16, 32>}, {pipeline_mode = #tpu.pipeline_mode<synchronous>, transform_indices = @transform_3, window_bounds = array<i64: 1, 32>}, {pipeline_mode = #tpu.pipeline_mode<synchronous>, transform_indices = @transform_4, window_bounds = array<i64: 32, 32>}, {pipeline_mode = #tpu.pipeline_mode<synchronous>, transform_indices = @transform_5, window_bounds = array<i64: 1, 32>}, {pipeline_mode = #tpu.pipeline_mode<synchronous>, transform_indices = @transform_6, window_bounds = array<i64: 32, 2>}, {pipeline_mode = #tpu.pipeline_mode<synchronous>, transform_indices = @transform_7, window_bounds = array<i64: 1, 2>}, {pipeline_mode = #tpu.pipeline_mode<synchronous>, transform_indices = @transform_8, window_bounds = array<i64: 32, 2>}, {pipeline_mode = #tpu.pipeline_mode<synchronous>, transform_indices = @transform_9, window_bounds = array<i64: 1, 2>}, {transform_indices = @transform_10, window_bounds = array<i64: 256, 2>}, {transform_indices = @transform_11, window_bounds = array<i64: 256, 2>}]} {
    %c0 = arith.constant 0 : index
    %0 = memref.load %arg1[%c0] : memref<1xi32, #tpu.memory_space<smem>>
    %c256_i32 = arith.constant 256 : i32
    %1 = arith.muli %arg0, %c256_i32 : i32
    %c0_0 = arith.constant 0 : index
    %c0_1 = arith.constant 0 : index
    %2 = vector.load %arg2[%c0_0, %c0_1] : memref<256x16xf32, #tpu.memory_space<vmem>>, vector<256x16xf32>
    %c0_2 = arith.constant 0 : index
    %c0_3 = arith.constant 0 : index
    %3 = vector.load %arg3[%c0_2, %c0_3] : memref<16x32xf32, #tpu.memory_space<vmem>>, vector<16x32xf32>
    %c0_4 = arith.constant 0 : index
    %c0_5 = arith.constant 0 : index
    %4 = vector.load %arg4[%c0_4, %c0_5] : memref<1x32xf32, #tpu.memory_space<vmem>>, vector<1x32xf32>
    %cst = arith.constant dense<0.000000e+00> : vector<256x32xf32>
    %5 = tpu.matmul %2, %3, %cst {dimension_numbers = #tpu.dot_dimension_numbers<[1], [0], [0], [1], [0, 0, 1, 1], [], []>} : vector<256x16xf32>, vector<16x32xf32>, vector<256x32xf32> -> vector<256x32xf32>
    %6 = vector.broadcast %4 : vector<1x32xf32> to vector<256x32xf32>
    %7 = arith.addf %5, %6 : vector<256x32xf32>
    %8 = tpu.iota {dimensions = array<i32: 0>} : vector<256x32xi32>
    %9 = vector.broadcast %1 : i32 to vector<256x32xi32>
    %10 = arith.addi %8, %9 : vector<256x32xi32>
    %11 = tpu.iota {dimensions = array<i32: 1>} : vector<256x32xi32>
    %c32_i32 = arith.constant 32 : i32
    %12 = vector.broadcast %c32_i32 : i32 to vector<256x32xi32>
    %13 = arith.muli %10, %12 : vector<256x32xi32>
    %14 = arith.addi %13, %11 : vector<256x32xi32>
    %15 = vector.broadcast %0 : i32 to vector<256x32xi32>
    %16 = arith.addi %14, %15 : vector<256x32xi32>
    %c843314857_i32 = arith.constant 843314857 : i32
    %17 = vector.broadcast %c843314857_i32 : i32 to vector<256x32xi32>
    %18 = arith.addi %16, %17 : vector<256x32xi32>
    %c16_i32 = arith.constant 16 : i32
    %19 = vector.broadcast %c16_i32 : i32 to vector<256x32xi32>
    %20 = arith.shrsi %18, %19 : vector<256x32xi32>
    %c65535_i32 = arith.constant 65535 : i32
    %21 = vector.broadcast %c65535_i32 : i32 to vector<256x32xi32>
    %22 = arith.andi %20, %21 : vector<256x32xi32>
    %23 = arith.xori %18, %22 : vector<256x32xi32>
    %c2146121005_i32 = arith.constant 2146121005 : i32
    %24 = vector.broadcast %c2146121005_i32 : i32 to vector<256x32xi32>
    %25 = arith.muli %23, %24 : vector<256x32xi32>
    %c15_i32 = arith.constant 15 : i32
    %26 = vector.broadcast %c15_i32 : i32 to vector<256x32xi32>
    %27 = arith.shrsi %25, %26 : vector<256x32xi32>
    %c131071_i32 = arith.constant 131071 : i32
    %28 = vector.broadcast %c131071_i32 : i32 to vector<256x32xi32>
    %29 = arith.andi %27, %28 : vector<256x32xi32>
    %30 = arith.xori %25, %29 : vector<256x32xi32>
    %c-2073254261_i32 = arith.constant -2073254261 : i32
    %31 = vector.broadcast %c-2073254261_i32 : i32 to vector<256x32xi32>
    %32 = arith.muli %30, %31 : vector<256x32xi32>
    %c16_i32_6 = arith.constant 16 : i32
    %33 = vector.broadcast %c16_i32_6 : i32 to vector<256x32xi32>
    %34 = arith.shrsi %32, %33 : vector<256x32xi32>
    %c65535_i32_7 = arith.constant 65535 : i32
    %35 = vector.broadcast %c65535_i32_7 : i32 to vector<256x32xi32>
    %36 = arith.andi %34, %35 : vector<256x32xi32>
    %37 = arith.xori %32, %36 : vector<256x32xi32>
    %c0_i32 = arith.constant 0 : i32
    %38 = vector.broadcast %c0_i32 : i32 to vector<256x32xi32>
    %39 = arith.cmpi sge, %37, %38 : vector<256x32xi32>
    %cst_8 = arith.constant 0.000000e+00 : f32
    %40 = vector.broadcast %cst_8 : f32 to vector<256x32xf32>
    %41 = arith.maximumf %7, %40 : vector<256x32xf32>
    %cst_9 = arith.constant 2.000000e+00 : f32
    %42 = vector.broadcast %cst_9 : f32 to vector<256x32xf32>
    %43 = arith.mulf %41, %42 : vector<256x32xf32>
    %cst_10 = arith.constant 0.000000e+00 : f32
    %44 = vector.broadcast %cst_10 : f32 to vector<256x32xf32>
    %45 = arith.select %39, %43, %44 : vector<256x32xi1>, vector<256x32xf32>
    %c0_11 = arith.constant 0 : index
    %c0_12 = arith.constant 0 : index
    %46 = vector.load %arg5[%c0_11, %c0_12] : memref<32x32xf32, #tpu.memory_space<vmem>>, vector<32x32xf32>
    %c0_13 = arith.constant 0 : index
    %c0_14 = arith.constant 0 : index
    %47 = vector.load %arg6[%c0_13, %c0_14] : memref<1x32xf32, #tpu.memory_space<vmem>>, vector<1x32xf32>
    %cst_15 = arith.constant dense<0.000000e+00> : vector<256x32xf32>
    %48 = tpu.matmul %45, %46, %cst_15 {dimension_numbers = #tpu.dot_dimension_numbers<[1], [0], [0], [1], [0, 0, 1, 1], [], []>} : vector<256x32xf32>, vector<32x32xf32>, vector<256x32xf32> -> vector<256x32xf32>
    %49 = vector.broadcast %47 : vector<1x32xf32> to vector<256x32xf32>
    %50 = arith.addf %48, %49 : vector<256x32xf32>
    %51 = tpu.iota {dimensions = array<i32: 0>} : vector<256x32xi32>
    %52 = vector.broadcast %1 : i32 to vector<256x32xi32>
    %53 = arith.addi %51, %52 : vector<256x32xi32>
    %54 = tpu.iota {dimensions = array<i32: 1>} : vector<256x32xi32>
    %c32_i32_16 = arith.constant 32 : i32
    %55 = vector.broadcast %c32_i32_16 : i32 to vector<256x32xi32>
    %56 = arith.muli %53, %55 : vector<256x32xi32>
    %57 = arith.addi %56, %54 : vector<256x32xi32>
    %58 = vector.broadcast %0 : i32 to vector<256x32xi32>
    %59 = arith.addi %57, %58 : vector<256x32xi32>
    %c1686629714_i32 = arith.constant 1686629714 : i32
    %60 = vector.broadcast %c1686629714_i32 : i32 to vector<256x32xi32>
    %61 = arith.addi %59, %60 : vector<256x32xi32>
    %c16_i32_17 = arith.constant 16 : i32
    %62 = vector.broadcast %c16_i32_17 : i32 to vector<256x32xi32>
    %63 = arith.shrsi %61, %62 : vector<256x32xi32>
    %c65535_i32_18 = arith.constant 65535 : i32
    %64 = vector.broadcast %c65535_i32_18 : i32 to vector<256x32xi32>
    %65 = arith.andi %63, %64 : vector<256x32xi32>
    %66 = arith.xori %61, %65 : vector<256x32xi32>
    %c2146121005_i32_19 = arith.constant 2146121005 : i32
    %67 = vector.broadcast %c2146121005_i32_19 : i32 to vector<256x32xi32>
    %68 = arith.muli %66, %67 : vector<256x32xi32>
    %c15_i32_20 = arith.constant 15 : i32
    %69 = vector.broadcast %c15_i32_20 : i32 to vector<256x32xi32>
    %70 = arith.shrsi %68, %69 : vector<256x32xi32>
    %c131071_i32_21 = arith.constant 131071 : i32
    %71 = vector.broadcast %c131071_i32_21 : i32 to vector<256x32xi32>
    %72 = arith.andi %70, %71 : vector<256x32xi32>
    %73 = arith.xori %68, %72 : vector<256x32xi32>
    %c-2073254261_i32_22 = arith.constant -2073254261 : i32
    %74 = vector.broadcast %c-2073254261_i32_22 : i32 to vector<256x32xi32>
    %75 = arith.muli %73, %74 : vector<256x32xi32>
    %c16_i32_23 = arith.constant 16 : i32
    %76 = vector.broadcast %c16_i32_23 : i32 to vector<256x32xi32>
    %77 = arith.shrsi %75, %76 : vector<256x32xi32>
    %c65535_i32_24 = arith.constant 65535 : i32
    %78 = vector.broadcast %c65535_i32_24 : i32 to vector<256x32xi32>
    %79 = arith.andi %77, %78 : vector<256x32xi32>
    %80 = arith.xori %75, %79 : vector<256x32xi32>
    %c0_i32_25 = arith.constant 0 : i32
    %81 = vector.broadcast %c0_i32_25 : i32 to vector<256x32xi32>
    %82 = arith.cmpi sge, %80, %81 : vector<256x32xi32>
    %cst_26 = arith.constant 0.000000e+00 : f32
    %83 = vector.broadcast %cst_26 : f32 to vector<256x32xf32>
    %84 = arith.maximumf %50, %83 : vector<256x32xf32>
    %cst_27 = arith.constant 2.000000e+00 : f32
    %85 = vector.broadcast %cst_27 : f32 to vector<256x32xf32>
    %86 = arith.mulf %84, %85 : vector<256x32xf32>
    %cst_28 = arith.constant 0.000000e+00 : f32
    %87 = vector.broadcast %cst_28 : f32 to vector<256x32xf32>
    %88 = arith.select %82, %86, %87 : vector<256x32xi1>, vector<256x32xf32>
    %c0_29 = arith.constant 0 : index
    %c0_30 = arith.constant 0 : index
    %89 = vector.load %arg7[%c0_29, %c0_30] : memref<32x2xf32, #tpu.memory_space<vmem>>, vector<32x2xf32>
    %c0_31 = arith.constant 0 : index
    %c0_32 = arith.constant 0 : index
    %90 = vector.load %arg8[%c0_31, %c0_32] : memref<1x2xf32, #tpu.memory_space<vmem>>, vector<1x2xf32>
    %c0_33 = arith.constant 0 : index
    %c0_34 = arith.constant 0 : index
    %91 = vector.load %arg9[%c0_33, %c0_34] : memref<32x2xf32, #tpu.memory_space<vmem>>, vector<32x2xf32>
    %c0_35 = arith.constant 0 : index
    %c0_36 = arith.constant 0 : index
    %92 = vector.load %arg10[%c0_35, %c0_36] : memref<1x2xf32, #tpu.memory_space<vmem>>, vector<1x2xf32>
    %cst_37 = arith.constant dense<0.000000e+00> : vector<256x2xf32>
    %93 = tpu.matmul %88, %89, %cst_37 {dimension_numbers = #tpu.dot_dimension_numbers<[1], [0], [0], [1], [0, 0, 1, 1], [], []>} : vector<256x32xf32>, vector<32x2xf32>, vector<256x2xf32> -> vector<256x2xf32>
    %94 = vector.broadcast %90 : vector<1x2xf32> to vector<256x2xf32>
    %95 = arith.addf %93, %94 : vector<256x2xf32>
    %c0_38 = arith.constant 0 : index
    %c0_39 = arith.constant 0 : index
    %96 = vector.load %arg11[%c0_38, %c0_39] : memref<256x2xf32, #tpu.memory_space<vmem>>, vector<256x2xf32>
    tpu.vector_store %arg11[%c0_38, %c0_39], %95 {strides = array<i32>} : memref<256x2xf32, #tpu.memory_space<vmem>>, vector<256x2xf32>,
    %cst_40 = arith.constant dense<0.000000e+00> : vector<256x2xf32>
    %97 = tpu.matmul %88, %91, %cst_40 {dimension_numbers = #tpu.dot_dimension_numbers<[1], [0], [0], [1], [0, 0, 1, 1], [], []>} : vector<256x32xf32>, vector<32x2xf32>, vector<256x2xf32> -> vector<256x2xf32>
    %98 = vector.broadcast %92 : vector<1x2xf32> to vector<256x2xf32>
    %99 = arith.addf %97, %98 : vector<256x2xf32>
    %cst_41 = arith.constant 0.000000e+00 : f32
    %100 = vector.broadcast %cst_41 : f32 to vector<256x2xf32>
    %101 = arith.maximumf %99, %100 : vector<256x2xf32>
    %102 = math.absf %99 : vector<256x2xf32>
    %cst_42 = arith.constant 0.000000e+00 : f32
    %103 = vector.broadcast %cst_42 : f32 to vector<256x2xf32>
    %104 = arith.subf %103, %102 : vector<256x2xf32>
    %105 = math.exp %104 : vector<256x2xf32>
    %cst_43 = arith.constant 1.000000e+00 : f32
    %106 = vector.broadcast %cst_43 : f32 to vector<256x2xf32>
    %107 = arith.addf %106, %105 : vector<256x2xf32>
    %108 = math.log %107 : vector<256x2xf32>
    %109 = arith.addf %101, %108 : vector<256x2xf32>
    %cst_44 = arith.constant 9.99999997E-7 : f32
    %110 = vector.broadcast %cst_44 : f32 to vector<256x2xf32>
    %111 = arith.addf %109, %110 : vector<256x2xf32>
    %c0_45 = arith.constant 0 : index
    %c0_46 = arith.constant 0 : index
    %112 = vector.load %arg12[%c0_45, %c0_46] : memref<256x2xf32, #tpu.memory_space<vmem>>, vector<256x2xf32>
    tpu.vector_store %arg12[%c0_45, %c0_46], %111 {strides = array<i32>} : memref<256x2xf32, #tpu.memory_space<vmem>>, vector<256x2xf32>,
    return
  }
  func.func @transform_0(%arg0: i32) -> i32 {
    %c0_i32 = arith.constant 0 : i32
    %c0_i32_0 = arith.constant 0 : i32
    return %c0_i32 : i32
  }
  func.func @transform_1(%arg0: i32) -> (i32, i32) {
    %c0_i32 = arith.constant 0 : i32
    %c0_i32_0 = arith.constant 0 : i32
    return %arg0, %c0_i32 : i32, i32
  }
  func.func @transform_2(%arg0: i32) -> (i32, i32) {
    %c0_i32 = arith.constant 0 : i32
    %c0_i32_0 = arith.constant 0 : i32
    %c0_i32_1 = arith.constant 0 : i32
    return %c0_i32, %c0_i32_0 : i32, i32
  }
  func.func @transform_3(%arg0: i32) -> (i32, i32) {
    %c0_i32 = arith.constant 0 : i32
    %c0_i32_0 = arith.constant 0 : i32
    %c0_i32_1 = arith.constant 0 : i32
    return %c0_i32, %c0_i32_0 : i32, i32
  }
  func.func @transform_4(%arg0: i32) -> (i32, i32) {
    %c0_i32 = arith.constant 0 : i32
    %c0_i32_0 = arith.constant 0 : i32
    %c0_i32_1 = arith.constant 0 : i32
    return %c0_i32, %c0_i32_0 : i32, i32
  }
  func.func @transform_5(%arg0: i32) -> (i32, i32) {
    %c0_i32 = arith.constant 0 : i32
    %c0_i32_0 = arith.constant 0 : i32
    %c0_i32_1 = arith.constant 0 : i32
    return %c0_i32, %c0_i32_0 : i32, i32
  }
  func.func @transform_6(%arg0: i32) -> (i32, i32) {
    %c0_i32 = arith.constant 0 : i32
    %c0_i32_0 = arith.constant 0 : i32
    %c0_i32_1 = arith.constant 0 : i32
    return %c0_i32, %c0_i32_0 : i32, i32
  }
  func.func @transform_7(%arg0: i32) -> (i32, i32) {
    %c0_i32 = arith.constant 0 : i32
    %c0_i32_0 = arith.constant 0 : i32
    %c0_i32_1 = arith.constant 0 : i32
    return %c0_i32, %c0_i32_0 : i32, i32
  }
  func.func @transform_8(%arg0: i32) -> (i32, i32) {
    %c0_i32 = arith.constant 0 : i32
    %c0_i32_0 = arith.constant 0 : i32
    %c0_i32_1 = arith.constant 0 : i32
    return %c0_i32, %c0_i32_0 : i32, i32
  }
  func.func @transform_9(%arg0: i32) -> (i32, i32) {
    %c0_i32 = arith.constant 0 : i32
    %c0_i32_0 = arith.constant 0 : i32
    %c0_i32_1 = arith.constant 0 : i32
    return %c0_i32, %c0_i32_0 : i32, i32
  }
  func.func @transform_10(%arg0: i32) -> (i32, i32) {
    %c0_i32 = arith.constant 0 : i32
    %c0_i32_0 = arith.constant 0 : i32
    return %arg0, %c0_i32 : i32, i32
  }
  func.func @transform_11(%arg0: i32) -> (i32, i32) {
    %c0_i32 = arith.constant 0 : i32
    %c0_i32_0 = arith.constant 0 : i32
    return %arg0, %c0_i32 : i32, i32
  }
}

</mosaic_0001>

<bundles_post_ra>
// kernel: tpu_custom_call.1
= control target key start
LH: loop header
LB: loop body
LE: loop exit
PB: predicated region body
PF: predicated region fallthrough
CT: control target
= control target key end

     0   :  { %vm78_vm0 = vcmask 130048   ;;  %v288_v12 = vlaneseq  ;;  %vm973_vm2 = vcmask 261120   ;;  %s3945_s2 = inlined_call_operand.vmem [shape: f32[16,32], index: 2, kind: input, shape index: {}]   ;;  %s3946_s1 = inlined_call_operand.vmem [shape: f32[256,16], index: 1, kind: input, shape index: {}]   ;;  %s3947_s3 = inlined_call_operand.vmem [shape: f32[1,32], index: 3, kind: input, shape index: {}]   ;;  %s3948_s0 = inlined_call_operand.<no memory space> [shape: s32[1], index: 0, kind: input, shape index: {}]   ;;  %s3949_s4 = inlined_call_operand.vmem [shape: f32[32,32], index: 4, kind: input, shape index: {}]   ;;  %s3950_s5 = inlined_call_operand.vmem [shape: f32[1,32], index: 5, kind: input, shape index: {}]   ;;  %s3951_s6 = inlined_call_operand.vmem [shape: f32[32,2], index: 6, kind: input, shape index: {}]   ;;  %s3952_s8 = inlined_call_operand.vmem [shape: f32[32,2], index: 8, kind: input, shape index: {}]   ;;  %s3953_s7 = inlined_call_operand.vmem [shape: f32[1,2], index: 7, kind: input, shape index: {}]   ;;  %s3954_s9 = inlined_call_operand.vmem [shape: f32[1,2], index: 9, kind: input, shape index: {}]   ;;  %s3955_s10 = inlined_call_operand.vmem [shape: f32[256,2], index: 10, kind: output, shape index: {0}]   ;;  %s3956_s11 = inlined_call_operand.vmem [shape: f32[256,2], index: 11, kind: output, shape index: {1}]  }
   0x1   :  { %v73_v0 = vld [vmem:[%s3945_s2 + $0x8] sm:$0xff]  ;;  %v72_v1 = vld [vmem:[%s3945_s2] sm:$0xff]  ;;  %v42_v4 = vld [vmem:[%s3946_s1 + $0x10] sm:$0xff]  ;;  %v3005_v20 = vstv %s3948_s0 }
   0x2   :  { %189 = vmatpush.msra.mxu0 %v73_v0  ;;  %v40_v2 = vld [vmem:[%s3946_s1] sm:$0xff]  ;;  %v41_v3 = vld [vmem:[%s3946_s1 + $0x8] sm:$0xff]  ;;  %v43_v5 = vld [vmem:[%s3946_s1 + $0x18] sm:$0xff]  ;;  %v2991_v14 = vshrl.u32 %v288_v12, 7  ;;  %v2994_v15 = vand.u32 127, %v288_v12 }
   0x3   :  { %v44_v6 = vld [vmem:[%s3946_s1 + $0x20] sm:$0xff]  ;;  %v45_v7 = vld [vmem:[%s3946_s1 + $0x28] sm:$0xff]  ;;  %v46_v8 = vld [vmem:[%s3946_s1 + $0x30] sm:$0xff] }
   0x4   :  { %190 = vmatpush.msra.mxu0 %v72_v1  ;;  %v47_v9 = vld [vmem:[%s3946_s1 + $0x38] sm:$0xff]  ;;  %v48_v10 = vld [vmem:[%s3946_s1 + $0x40] sm:$0xff]  ;;  %v49_v11 = vld [vmem:[%s3946_s1 + $0x48] sm:$0xff]  ;;  %v356_v16 = vmul.u32 32, %v2991_v14  ;;  %v290_v17 = vadd.s32 8, %v2991_v14  ;;  %v291_v27 = vadd.s32 16, %v2991_v14 }
   0x5   :  { %2426 = vmatmul.msk.f32.vlgmr.msra.gmra.mxu0 %vm78_vm0, %v40_v2  ;;  %v50_v13 = vld [vmem:[%s3946_s1 + $0x50] sm:$0xff]  ;;  %v51_v18 = vld [vmem:[%s3946_s1 + $0x58] sm:$0xff]  ;;  %v52_v24 = vld [vmem:[%s3946_s1 + $0x60] sm:$0xff]  ;;  %v292_v38 = vadd.s32 24, %v2991_v14  ;;  %v293_v48 = vadd.s32 32, %v2991_v14  ;;  %v294_v55 = vadd.s32 40, %v2991_v14 }
   0x6   :  { %v388_v19 = vadd.s32 %v356_v16, %v2994_v15  ;;  %v357_v21 = vmul.u32 32, %v290_v17  ;;  %v968_v25 = vld [vmem:[%s3949_s4 + $0x18] sm:$0xff]  ;;  %v967_v28 = vld [vmem:[%s3949_s4 + $0x10] sm:$0xff]  ;;  %v966_v30 = vld [vmem:[%s3949_s4 + $0x8] sm:$0xff]  ;;  %v358_v32 = vmul.u32 32, %v291_v27 }
   0x7   :  { %1082 = vmatpush.msra.mxu1 %v968_v25  ;;  %v965_v33 = vld [vmem:[%s3949_s4] sm:$0xff]  ;;  %v53_v35 = vld [vmem:[%s3946_s1 + $0x68] sm:$0xff]  ;;  %v359_v42 = vmul.u32 32, %v292_v38  ;;  %v54_v44 = vld [vmem:[%s3946_s1 + $0x70] sm:$0xff]  ;;  %v360_v53 = vmul.u32 32, %v293_v48  ;;  %v361_v62 = vmul.u32 32, %v294_v55 }
   0x8   :  { %v3009_v22 = vadd.s32 %v3005_v20, %v388_v19  ;;  %v389_v23 = vadd.s32 %v357_v21, %v2994_v15  ;;  %v390_v37 = vadd.s32 %v358_v32, %v2994_v15  ;;  %v55_v56 = vld [vmem:[%s3946_s1 + $0x78] sm:$0xff]  ;;  %v57_v32 = vld [vmem:[%s3946_s1 + $0x88] sm:$0xff] }
   0x9   :  { %1083 = vmatpush.msra.mxu1 %v967_v28  ;;  %v391_v47 = vadd.s32 %v359_v42, %v2994_v15  ;;  %v392_v60 = vadd.s32 %v360_v53, %v2994_v15  ;;  %v58_v53 = vld [vmem:[%s3946_s1 + $0x90] sm:$0xff] }
   0xa   :  { %v453_v26 = vadd.s32 843314857, %v3009_v22  ;;  %v3025_v29 = vadd.s32 %v3005_v20, %v389_v23  ;;  %v3041_v41 = vadd.s32 %v3005_v20, %v390_v37 }
   0xb   :  { %1084 = vmatpush.msra.mxu1 %v966_v30  ;;  %v3051_v52 = vadd.s32 %v3005_v20, %v391_v47  ;;  %v3061_v2 = vadd.s32 %v3005_v20, %v392_v60 }
   0xc   :  { %v2458_v31 = vshrl.u32 %v453_v26, 16  ;;  %v454_v34 = vadd.s32 843314857, %v3025_v29  ;;  %v455_v46 = vadd.s32 843314857, %v3041_v41 }
   0xd   :  { %2427 = vmatmul.msk.f32.gmra.mxu0 %vm78_vm0, %v41_v3  ;;  %1085 = vmatpush.msra.mxu1 %v965_v33  ;;  %v456_v59 = vadd.s32 843314857, %v3051_v52  ;;  %v3066_v3 = vld [vmem:[%s3947_s3] ss:$0 sm:$0xff]  ;;  %v457_v12 = vadd.s32 843314857, %v3061_v2 }
   0xe   :  { %v549_v36 = vxor.u32 %v2458_v31, %v453_v26  ;;  %v2459_v39 = vshrl.u32 %v454_v34, 16  ;;  %v2460_v51 = vshrl.u32 %v455_v46, 16 }
   0xf   :  { %v2461_v1 = vshrl.u32 %v456_v59, 16 }
  0x10   :  { %v581_v40 = vmul.u32 2146121005, %v549_v36  ;;  %v550_v43 = vxor.u32 %v2459_v39, %v454_v34  ;;  %v551_v58 = vxor.u32 %v2460_v51, %v455_v46  ;;  %v296_v36 = vadd.s32 56, %v2991_v14 }
  0x12   :  { %v2490_v45 = vshrl.u32 %v581_v40, 15  ;;  %v582_v49 = vmul.u32 2146121005, %v550_v43  ;;  %v583_v0 = vmul.u32 2146121005, %v551_v58 }
  0x14   :  { %v677_v50 = vxor.u32 %v2490_v45, %v581_v40  ;;  %v2491_v54 = vshrl.u32 %v582_v49, 15  ;;  %v363_v45 = vmul.u32 32, %v296_v36 }
  0x15   :  { %2428 = vmatmul.msk.f32.gmra.mxu0 %vm78_vm0, %v42_v4 }
  0x16   :  { %v709_v57 = vmul.u32 2221713035, %v677_v50  ;;  %v678_v61 = vxor.u32 %v2491_v54, %v582_v49  ;;  %v297_v50 = vadd.s32 64, %v2991_v14 }
  0x18   :  { %v2522_v63 = vshrl.u32 %v709_v57, 16  ;;  %v710_v4 = vmul.u32 2221713035, %v678_v61 }
  0x1a   :  { %v2523_v17 = vshrl.u32 %v710_v4, 16 }
  0x1c   :  { %v806_v27 = vxor.u32 %v2523_v17, %v710_v4 }
  0x1d   :  { %2429 = vmatmul.msk.f32.gmra.mxu0 %vm78_vm0, %v43_v5  ;;  %v393_v5 = vadd.s32 %v361_v62, %v2994_v15  ;;  %v364_v62 = vmul.u32 32, %v297_v50 }
  0x1e   :  { %vm838_vm3 = vcmp.ge.s32.totalorder %v806_v27, 0 }
  0x25   :  { %2430 = vmatmul.msk.f32.gmra.mxu0 %vm78_vm0, %v44_v6  ;;  %v295_v6 = vadd.s32 48, %v2991_v14 }
  0x27   :  { %v362_v19 = vmul.u32 32, %v295_v6 }
  0x29   :  { %v394_v30 = vadd.s32 %v362_v19, %v2994_v15 }
  0x2b   :  { %v3089_v40 = vadd.s32 %v3005_v20, %v394_v30 }
  0x2d   :  { %2431 = vmatmul.msk.f32.gmra.mxu0 %vm78_vm0, %v45_v7  ;;  %v459_v49 = vadd.s32 843314857, %v3089_v40 }
  0x2f   :  { %v2464_v61 = vshrl.u32 %v459_v49, 16 }
  0x35   :  { %2432 = vmatmul.msk.f32.gmra.mxu0 %vm78_vm0, %v46_v8  ;;  %v56_v8 = vld [vmem:[%s3946_s1 + $0x80] sm:$0xff] }
  0x3d   :  { %2433 = vmatmul.msk.f32.gmra.mxu0 %vm78_vm0, %v47_v9  ;;  %v805_v9 = vxor.u32 %v2522_v63, %v709_v57  ;;  %v395_v57 = vadd.s32 %v363_v45, %v2994_v15 }
  0x3f   :  { %vm837_vm1 = vcmp.ge.s32.totalorder %v805_v9, 0 }
  0x45   :  { %2434 = vmatmul.msk.f32.gmra.mxu0 %vm78_vm0, %v48_v10  ;;  %v2492_v10 = vshrl.u32 %v583_v0, 15 }
  0x47   :  { %v679_v21 = vxor.u32 %v2492_v10, %v583_v0  ;;  %v59_v10 = vld [vmem:[%s3946_s1 + $0x98] sm:$0xff] }
  0x49   :  { %v711_v33 = vmul.u32 2221713035, %v679_v21 }
  0x4b   :  { %v2524_v42 = vshrl.u32 %v711_v33, 16 }
  0x4d   :  { %2435 = vmatmul.msk.f32.gmra.mxu0 %vm78_vm0, %v49_v11  ;;  %v552_v11 = vxor.u32 %v2461_v1, %v456_v59  ;;  %v807_v54 = vxor.u32 %v2524_v42, %v711_v33  ;;  %v3101_v1 = vadd.s32 %v3005_v20, %v395_v57  ;;  %v61_v57 = vld [vmem:[%s3946_s1 + $0xa8] sm:$0xff] }
  0x4f   :  { %v584_v23 = vmul.u32 2146121005, %v552_v11  ;;  %vm839_vm4 = vcmp.ge.s32.totalorder %v807_v54, 0 }
  0x51   :  { %v2493_v34 = vshrl.u32 %v584_v23, 15 }
  0x53   :  { %v680_v43 = vxor.u32 %v2493_v34, %v584_v23 }
  0x55   :  { %2436 = vmatmul.msk.f32.gmra.mxu0 %vm78_vm0, %v50_v13  ;;  %v712_v55 = vmul.u32 2221713035, %v680_v43 }
  0x57   :  { %v2525_v63 = vshrl.u32 %v712_v55, 16 }
  0x59   :  { %v808_v11 = vxor.u32 %v2525_v63, %v712_v55 }
  0x5b   :  { %vm840_vm5 = vcmp.ge.s32.totalorder %v808_v11, 0 }
  0x5d   :  { %2437 = vmatmul.msk.f32.gmra.mxu0 %vm78_vm0, %v51_v18  ;;  %v3077_v18 = vadd.s32 %v3005_v20, %v393_v5 }
  0x5f   :  { %v458_v28 = vadd.s32 843314857, %v3077_v18 }
  0x61   :  { %v2463_v39 = vshrl.u32 %v458_v28, 16 }
  0x63   :  { %v554_v48 = vxor.u32 %v2463_v39, %v458_v28  ;;  %v299_v39 = vadd.s32 80, %v2991_v14 }
  0x65   :  { %2438 = vmatmul.msk.f32.gmra.mxu0 %vm78_vm0, %v52_v24  ;;  %v2462_v24 = vshrl.u32 %v457_v12, 16  ;;  %v586_v60 = vmul.u32 2146121005, %v554_v48 }
  0x67   :  { %v2495_v6 = vshrl.u32 %v586_v60, 15 }
  0x69   :  { %v682_v21 = vxor.u32 %v2495_v6, %v586_v60 }
  0x6d   :  { %2439 = vmatmul.msk.f32.gmra.mxu0 %vm78_vm0, %v53_v35  ;;  %v553_v35 = vxor.u32 %v2462_v24, %v457_v12 }
  0x75   :  { %2440 = vmatmul.msk.f32.gmra.mxu0 %vm78_vm0, %v54_v44  ;;  %v585_v44 = vmul.u32 2146121005, %v553_v35  ;;  %v60_v35 = vld [vmem:[%s3946_s1 + $0xa0] sm:$0xff] }
  0x7d   :  { %2441 = vmatmul.msk.f32.gmra.mxu0 %vm78_vm0, %v55_v56  ;;  %v2494_v56 = vshrl.u32 %v585_v44, 15 }
  0x7f   :  { %v681_v0 = vxor.u32 %v2494_v56, %v585_v44 }
  0x81   :  { %v713_v12 = vmul.u32 2221713035, %v681_v0 }
  0x82   :  { %v192_v7 = vpop.f32.mrf.mxu0 }
  0x83   :  { %v193_v13 = vadd.f32 %v3066_v3, %v192_v7  ;;  %v555_v7 = vxor.u32 %v2464_v61, %v459_v49  ;;  %v366_v49 = vmul.u32 32, %v299_v39  ;;  %v300_v61 = vadd.s32 88, %v2991_v14 }
  0x84   :  { %v302_v39 = vadd.s32 104, %v2991_v14 }
  0x85   :  { %v869_v16 = vmax.f32 %v193_v13, 0.0  ;;  %2442 = vmatmul.msk.f32.gmra.mxu0 %vm78_vm0, %v56_v8  ;;  %v396_v8 = vadd.s32 %v364_v62, %v2994_v15  ;;  %v460_v13 = vadd.s32 843314857, %v3101_v1  ;;  %v587_v23 = vmul.u32 2146121005, %v555_v7 }
  0x86   :  { %v398_v60 = vadd.s32 %v366_v49, %v2994_v15 }
  0x87   :  { %v901_v25 = vmul.f32 2.0, %v869_v16  ;;  %v298_v16 = vadd.s32 72, %v2991_v14  ;;  %v3113_v24 = vadd.s32 %v3005_v20, %v396_v8  ;;  %v367_v8 = vmul.u32 32, %v300_v61 }
  0x88   :  { %v3137_v7 = vadd.s32 %v3005_v20, %v398_v60 }
  0x89   :  { %v933_v26 = vsel %vm837_vm1, %v901_v25, 0.0  ;;  %v2526_v25 = vshrl.u32 %v713_v12, 16  ;;  %v365_v27 = vmul.u32 32, %v298_v16  ;;  %v461_v33 = vadd.s32 843314857, %v3113_v24 }
  0x8a   :  { %v195_v31 = vpop.f32.mrf.mxu0  ;;  %2554 = vmatmul.msk.f32.vlgmr.msra.gmra.mxu1 %vm973_vm2, %v933_v26  ;;  %v2465_v26 = vshrl.u32 %v460_v13, 16 }
  0x8b   :  { %v196_v37 = vadd.f32 %v3066_v3, %v195_v31  ;;  %v714_v31 = vmul.u32 2221713035, %v682_v21  ;;  %v809_v36 = vxor.u32 %v2526_v25, %v713_v12  ;;  %v399_v25 = vadd.s32 %v367_v8, %v2994_v15 }
  0x8c   :  { %v303_v8 = vadd.s32 112, %v2991_v14 }
  0x8d   :  { %v870_v38 = vmax.f32 %v196_v37, 0.0  ;;  %2443 = vmatmul.msk.f32.gmra.mxu0 %vm78_vm0, %v57_v32  ;;  %v2496_v32 = vshrl.u32 %v587_v23, 15  ;;  %v556_v37 = vxor.u32 %v2465_v26, %v460_v13  ;;  %v2527_v44 = vshrl.u32 %v714_v31, 16 }
  0x8e   :  { %vm841_vm6 = vcmp.ge.s32.totalorder %v809_v36, 0  ;;  %v301_v13 = vadd.s32 96, %v2991_v14 }
  0x8f   :  { %v902_v46 = vmul.f32 2.0, %v870_v38  ;;  %v397_v38 = vadd.s32 %v365_v27, %v2994_v15  ;;  %v683_v45 = vxor.u32 %v2496_v32, %v587_v23  ;;  %v463_v23 = vadd.s32 843314857, %v3137_v7 }
  0x91   :  { %v934_v47 = vsel %vm838_vm3, %v902_v46, 0.0  ;;  %v2466_v46 = vshrl.u32 %v461_v33, 16  ;;  %v3125_v48 = vadd.s32 %v3005_v20, %v397_v38  ;;  %v715_v54 = vmul.u32 2221713035, %v683_v45 }
  0x92   :  { %v198_v51 = vpop.f32.mrf.mxu0  ;;  %2555 = vmatmul.msk.f32.gmra.mxu1 %vm973_vm2, %v934_v47  ;;  %v588_v47 = vmul.u32 2146121005, %v556_v37 }
  0x93   :  { %v199_v58 = vadd.f32 %v3066_v3, %v198_v51  ;;  %v557_v55 = vxor.u32 %v2466_v46, %v461_v33  ;;  %v2528_v0 = vshrl.u32 %v715_v54, 16  ;;  %v2468_v33 = vshrl.u32 %v463_v23, 16 }
  0x95   :  { %v871_v59 = vmax.f32 %v199_v58, 0.0  ;;  %2444 = vmatmul.msk.f32.gmra.mxu0 %vm78_vm0, %v58_v53  ;;  %v810_v53 = vxor.u32 %v2527_v44, %v714_v31  ;;  %v2497_v58 = vshrl.u32 %v588_v47, 15  ;;  %v811_v11 = vxor.u32 %v2528_v0, %v715_v54  ;;  %v64_v0 = vld [vmem:[%s3946_s1 + $0xc0] sm:$0xff] }
  0x96   :  { %v559_v46 = vxor.u32 %v2468_v33, %v463_v23  ;;  %v369_v54 = vmul.u32 32, %v302_v39 }
  0x97   :  { %v903_v4 = vmul.f32 2.0, %v871_v59  ;;  %v462_v59 = vadd.s32 843314857, %v3125_v48  ;;  %vm842_vm7 = vcmp.ge.s32.totalorder %v810_v53, 0  ;;  %vm843_vm8 = vcmp.ge.s32.totalorder %v811_v11, 0 }
  0x99   :  { %v935_v5 = vsel %vm839_vm4, %v903_v4, 0.0  ;;  %v589_v4 = vmul.u32 2146121005, %v557_v55  ;;  %v2467_v6 = vshrl.u32 %v462_v59, 16 }
  0x9a   :  { %v201_v9 = vpop.f32.mrf.mxu0  ;;  %2556 = vmatmul.msk.f32.gmra.mxu1 %vm973_vm2, %v935_v5  ;;  %v684_v5 = vxor.u32 %v2497_v58, %v588_v47 }
  0x9b   :  { %v202_v17 = vadd.f32 %v3066_v3, %v201_v9  ;;  %v2498_v12 = vshrl.u32 %v589_v4, 15  ;;  %v558_v21 = vxor.u32 %v2467_v6, %v462_v59 }
  0x9d   :  { %v872_v19 = vmax.f32 %v202_v17, 0.0  ;;  %2445 = vmatmul.msk.f32.gmra.mxu0 %vm78_vm0, %v59_v10  ;;  %v62_v17 = vld [vmem:[%s3946_s1 + $0xb0] sm:$0xff]  ;;  %v590_v32 = vmul.u32 2146121005, %v558_v21 }
  0x9f   :  { %v904_v28 = vmul.f32 2.0, %v872_v19  ;;  %v716_v19 = vmul.u32 2221713035, %v684_v5  ;;  %v2499_v45 = vshrl.u32 %v590_v32, 15 }
  0xa1   :  { %v936_v30 = vsel %vm840_vm5, %v904_v28, 0.0  ;;  %v685_v28 = vxor.u32 %v2498_v12, %v589_v4  ;;  %v2529_v31 = vshrl.u32 %v716_v19, 16  ;;  %v686_v55 = vxor.u32 %v2499_v45, %v590_v32 }
  0xa2   :  { %v204_v34 = vpop.f32.mrf.mxu0  ;;  %2557 = vmatmul.msk.f32.gmra.mxu1 %vm973_vm2, %v936_v30  ;;  %v368_v30 = vmul.u32 32, %v301_v13 }
  0xa3   :  { %v205_v42 = vadd.f32 %v3066_v3, %v204_v34  ;;  %v3149_v34 = vadd.s32 %v3005_v20, %v399_v25  ;;  %v717_v37 = vmul.u32 2221713035, %v685_v28  ;;  %v812_v44 = vxor.u32 %v2529_v31, %v716_v19 }
  0xa4   :  { %v400_v38 = vadd.s32 %v368_v30, %v2994_v15  ;;  %v718_v4 = vmul.u32 2221713035, %v686_v55  ;;  %v370_v19 = vmul.u32 32, %v303_v8  ;;  %v65_v30 = vld [vmem:[%s3946_s1 + $0xc8] sm:$0xff]  ;;  %v66_v55 = vld [vmem:[%s3946_s1 + $0xd0] sm:$0xff] }
  0xa5   :  { %v873_v43 = vmax.f32 %v205_v42, 0.0  ;;  %2446 = vmatmul.msk.f32.gmra.mxu0 %vm78_vm0, %v60_v35  ;;  %v464_v47 = vadd.s32 843314857, %v3149_v34  ;;  %vm844_vm9 = vcmp.ge.s32.totalorder %v812_v44, 0 }
  0xa6   :  { %v3161_v53 = vadd.s32 %v3005_v20, %v400_v38  ;;  %v2531_v13 = vshrl.u32 %v718_v4, 16 }
  0xa7   :  { %v905_v50 = vmul.f32 2.0, %v873_v43  ;;  %v63_v43 = vld [vmem:[%s3946_s1 + $0xb8] sm:$0xff] }
  0xa8   :  { %v465_v61 = vadd.s32 843314857, %v3161_v53  ;;  %v814_v31 = vxor.u32 %v2531_v13, %v718_v4 }
  0xa9   :  { %v937_v51 = vsel %vm841_vm6, %v905_v50, 0.0 }
  0xaa   :  { %v207_v56 = vpop.f32.mrf.mxu0  ;;  %2558 = vmatmul.msk.f32.gmra.mxu1 %vm973_vm2, %v937_v51  ;;  %v2530_v51 = vshrl.u32 %v717_v37, 16  ;;  %v2470_v11 = vshrl.u32 %v465_v61, 16  ;;  %vm846_vm11 = vcmp.ge.s32.totalorder %v814_v31, 0 }
  0xab   :  { %v208_v62 = vadd.f32 %v3066_v3, %v207_v56  ;;  %v591_v56 = vmul.u32 2146121005, %v559_v46 }
  0xac   :  { %v813_v60 = vxor.u32 %v2530_v51, %v717_v37  ;;  %v561_v25 = vxor.u32 %v2470_v11, %v465_v61 }
  0xad   :  { %v874_v63 = vmax.f32 %v208_v62, 0.0  ;;  %2447 = vmatmul.msk.f32.gmra.mxu0 %vm78_vm0, %v61_v57  ;;  %v2469_v57 = vshrl.u32 %v464_v47, 16  ;;  %v401_v62 = vadd.s32 %v369_v54, %v2994_v15  ;;  %v2500_v5 = vshrl.u32 %v591_v56, 15 }
  0xae   :  { %vm845_vm10 = vcmp.ge.s32.totalorder %v813_v60, 0  ;;  %v593_v38 = vmul.u32 2146121005, %v561_v25  ;;  %v306_v25 = vadd.s32 136, %v2991_v14 }
  0xaf   :  { %v906_v9 = vmul.f32 2.0, %v874_v63  ;;  %v560_v6 = vxor.u32 %v2469_v57, %v464_v47  ;;  %v3173_v12 = vadd.s32 %v3005_v20, %v401_v62 }
  0xb1   :  { %v938_v10 = vsel %vm842_vm7, %v906_v9, 0.0 }
  0xb2   :  { %v210_v16 = vpop.f32.mrf.mxu0  ;;  %2559 = vmatmul.msk.f32.gmra.mxu1 %vm973_vm2, %v938_v10 }
  0xb3   :  { %v211_v26 = vadd.f32 %v3066_v3, %v210_v16  ;;  %v687_v16 = vxor.u32 %v2500_v5, %v591_v56 }
  0xb5   :  { %v875_v27 = vmax.f32 %v211_v26, 0.0  ;;  %2448 = vmatmul.msk.f32.gmra.mxu0 %vm78_vm0, %v62_v17  ;;  %v592_v17 = vmul.u32 2146121005, %v560_v6  ;;  %v466_v26 = vadd.s32 843314857, %v3173_v12 }
  0xb6   :  { %v719_v32 = vmul.u32 2221713035, %v687_v16 }
  0xb7   :  { %v907_v35 = vmul.f32 2.0, %v875_v27  ;;  %v304_v27 = vadd.s32 120, %v2991_v14  ;;  %v2501_v33 = vshrl.u32 %v592_v17, 15  ;;  %v2471_v39 = vshrl.u32 %v466_v26, 16 }
  0xb9   :  { %v939_v36 = vsel %vm843_vm8, %v907_v35, 0.0  ;;  %v402_v35 = vadd.s32 %v370_v19, %v2994_v15  ;;  %v688_v44 = vxor.u32 %v2501_v33, %v592_v17  ;;  %v67_v17 = vld [vmem:[%s3946_s1 + $0xd8] sm:$0xff] }
  0xba   :  { %v213_v42 = vpop.f32.mrf.mxu0  ;;  %2560 = vmatmul.msk.f32.gmra.mxu1 %vm973_vm2, %v939_v36 }
  0xbb   :  { %v214_v49 = vadd.f32 %v3066_v3, %v213_v42  ;;  %v371_v42 = vmul.u32 32, %v304_v27  ;;  %v3185_v45 = vadd.s32 %v3005_v20, %v402_v35  ;;  %v720_v57 = vmul.u32 2221713035, %v688_v44 }
  0xbc   :  { %v373_v35 = vmul.u32 32, %v306_v25 }
  0xbd   :  { %v876_v50 = vmax.f32 %v214_v49, 0.0  ;;  %2449 = vmatmul.msk.f32.gmra.mxu0 %vm78_vm0, %v63_v43  ;;  %v2532_v43 = vshrl.u32 %v719_v32, 16  ;;  %v2502_v49 = vshrl.u32 %v593_v38, 15  ;;  %v403_v51 = vadd.s32 %v371_v42, %v2994_v15 }
  0xbe   :  { %v2533_v4 = vshrl.u32 %v720_v57, 16 }
  0xbf   :  { %v908_v58 = vmul.f32 2.0, %v876_v50  ;;  %v562_v50 = vxor.u32 %v2471_v39, %v466_v26  ;;  %v815_v56 = vxor.u32 %v2532_v43, %v719_v32  ;;  %v689_v62 = vxor.u32 %v2502_v49, %v593_v38 }
  0xc0   :  { %v816_v19 = vxor.u32 %v2533_v4, %v720_v57  ;;  %v1703_v4 = vld [vmem:[%s3952_s8 + $0x18] sm:$0xff] }
  0xc1   :  { %v940_v59 = vsel %vm844_vm9, %v908_v58, 0.0  ;;  %v467_v58 = vadd.s32 843314857, %v3185_v45  ;;  %vm847_vm12 = vcmp.ge.s32.totalorder %v815_v56, 0  ;;  %1965 = vmatpush.msra.mxu3 %v1703_v4 }
  0xc2   :  { %v216_v63 = vpop.f32.mrf.mxu0  ;;  %2561 = vmatmul.msk.f32.gmra.mxu1 %vm973_vm2, %v940_v59  ;;  %v305_v59 = vadd.s32 128, %v2991_v14  ;;  %vm848_vm13 = vcmp.ge.s32.totalorder %v816_v19, 0 }
  0xc3   :  { %v217_v9 = vadd.f32 %v3066_v3, %v216_v63  ;;  %v594_v63 = vmul.u32 2146121005, %v562_v50  ;;  %v2472_v5 = vshrl.u32 %v467_v58, 16  ;;  %v405_v50 = vadd.s32 %v373_v35, %v2994_v15  ;;  %v1695_v35 = vld [vmem:[%s3951_s6] sm:$0xff] }
  0xc4   :  { %v372_v6 = vmul.u32 32, %v305_v59 }
  0xc5   :  { %v877_v10 = vmax.f32 %v217_v9, 0.0  ;;  %2450 = vmatmul.msk.f32.gmra.mxu0 %vm78_vm0, %v64_v0  ;;  %v3197_v0 = vadd.s32 %v3005_v20, %v403_v51  ;;  %v2503_v11 = vshrl.u32 %v594_v63, 15 }
  0xc7   :  { %v909_v21 = vmul.f32 2.0, %v877_v10  ;;  %v721_v10 = vmul.u32 2221713035, %v689_v62  ;;  %v468_v13 = vadd.s32 843314857, %v3197_v0 }
  0xc9   :  { %v941_v23 = vsel %vm845_vm10, %v909_v21, 0.0  ;;  %v563_v21 = vxor.u32 %v2472_v5, %v467_v58  ;;  %v2473_v31 = vshrl.u32 %v468_v13, 16 }
  0xca   :  { %v219_v28 = vpop.f32.mrf.mxu0  ;;  %2562 = vmatmul.msk.f32.gmra.mxu1 %vm973_vm2, %v941_v23  ;;  %v404_v23 = vadd.s32 %v372_v6, %v2994_v15  ;;  %v308_v6 = vadd.s32 152, %v2991_v14 }
  0xcb   :  { %v220_v36 = vadd.f32 %v3066_v3, %v219_v28  ;;  %v2534_v28 = vshrl.u32 %v721_v10, 16  ;;  %v595_v32 = vmul.u32 2146121005, %v563_v21  ;;  %v564_v43 = vxor.u32 %v2473_v31, %v468_v13 }
  0xcc   :  { %v3209_v33 = vadd.s32 %v3005_v20, %v404_v23 }
  0xcd   :  { %v878_v37 = vmax.f32 %v220_v36, 0.0  ;;  %2451 = vmatmul.msk.f32.gmra.mxu0 %vm78_vm0, %v65_v30  ;;  %v690_v30 = vxor.u32 %v2503_v11, %v594_v63  ;;  %v817_v39 = vxor.u32 %v2534_v28, %v721_v10  ;;  %v596_v57 = vmul.u32 2146121005, %v564_v43  ;;  %v1698_v63 = vld [vmem:[%s3951_s6 + $0x18] sm:$0xff]  ;;  %v1697_v10 = vld [vmem:[%s3951_s6 + $0x10] sm:$0xff] }
  0xce   :  { %v469_v49 = vadd.s32 843314857, %v3209_v33  ;;  %1816 = vmatpush.msra.mxu2 %v1698_v63  ;;  %v1702_v11 = vld [vmem:[%s3952_s8 + $0x10] sm:$0xff] }
  0xcf   :  { %v910_v46 = vmul.f32 2.0, %v878_v37  ;;  %v307_v37 = vadd.s32 144, %v2991_v14  ;;  %v722_v42 = vmul.u32 2221713035, %v690_v30  ;;  %vm849_vm14 = vcmp.ge.s32.totalorder %v817_v39, 0  ;;  %1966 = vmatpush.msra.mxu3 %v1702_v11 }
  0xd0   :  { %v2474_v59 = vshrl.u32 %v469_v49, 16  ;;  %1817 = vmatpush.msra.mxu2 %v1697_v10  ;;  %v375_v30 = vmul.u32 32, %v308_v6 }
  0xd1   :  { %v942_v47 = vsel %vm846_vm11, %v910_v46, 0.0  ;;  %v68_v46 = vld [vmem:[%s3946_s1 + $0xe0] sm:$0xff]  ;;  %v2535_v56 = vshrl.u32 %v722_v42, 16 }
  0xd2   :  { %v222_v54 = vpop.f32.mrf.mxu0  ;;  %2563 = vmatmul.msk.f32.gmra.mxu1 %vm973_vm2, %v942_v47  ;;  %v2504_v47 = vshrl.u32 %v595_v32, 15  ;;  %v565_v19 = vxor.u32 %v2474_v59, %v469_v49  ;;  %v309_v49 = vadd.s32 160, %v2991_v14 }
  0xd3   :  { %v223_v60 = vadd.f32 %v3066_v3, %v222_v54  ;;  %v374_v54 = vmul.u32 32, %v307_v37 }
  0xd4   :  { %v691_v58 = vxor.u32 %v2504_v47, %v595_v32  ;;  %v407_v47 = vadd.s32 %v375_v30, %v2994_v15  ;;  %v376_v4 = vmul.u32 32, %v309_v49  ;;  %v1186_v49 = vadd.s32 1686629714, %v3051_v52 }
  0xd5   :  { %v879_v61 = vmax.f32 %v223_v60, 0.0  ;;  %2452 = vmatmul.msk.f32.gmra.mxu0 %vm78_vm0, %v66_v55  ;;  %v1183_v60 = vadd.s32 1686629714, %v3009_v22  ;;  %v406_v5 = vadd.s32 %v374_v54, %v2994_v15  ;;  %v818_v22 = vxor.u32 %v2535_v56, %v722_v42 }
  0xd6   :  { %v3271_v63 = vadd.s32 %v3005_v20, %v407_v47 }
  0xd7   :  { %v911_v8 = vmul.f32 2.0, %v879_v61  ;;  %v3222_v61 = vadd.s32 %v3005_v20, %v405_v50  ;;  %v2586_v21 = vshrl.u32 %v1183_v60, 16  ;;  %v3251_v28 = vadd.s32 %v3005_v20, %v406_v5 }
  0xd8   :  { %vm850_vm15 = vcmp.ge.s32.totalorder %v818_v22, 0 }
  0xd9   :  { %v943_v9 = vsel %vm847_vm12, %v911_v8, 0.0  ;;  %v470_v23 = vadd.s32 843314857, %v3222_v61  ;;  %v1279_v39 = vxor.u32 %v2586_v21, %v1183_v60 }
  0xda   :  { %v225_v16 = vpop.f32.mrf.mxu0  ;;  %2564 = vmatmul.msk.f32.gmra.mxu1 %vm973_vm2, %v943_v9  ;;  %v2505_v9 = vshrl.u32 %v596_v57, 15 }
  0xdb   :  { %v226_v26 = vadd.f32 %v3066_v3, %v225_v16  ;;  %v69_v16 = vld [vmem:[%s3946_s1 + $0xe8] sm:$0xff]  ;;  %v2475_v42 = vshrl.u32 %v470_v23, 16 }
  0xdc   :  { %v692_v32 = vxor.u32 %v2505_v9, %v596_v57 }
  0xdd   :  { %v880_v27 = vmax.f32 %v226_v26, 0.0  ;;  %2453 = vmatmul.msk.f32.gmra.mxu0 %vm78_vm0, %v67_v17  ;;  %v723_v17 = vmul.u32 2221713035, %v691_v58  ;;  %v1696_v26 = vld [vmem:[%s3951_s6 + $0x8] sm:$0xff]  ;;  %v1311_v58 = vmul.u32 2146121005, %v1279_v39 }
  0xde   :  { %1818 = vmatpush.msra.mxu2 %v1696_v26 }
  0xdf   :  { %v912_v36 = vmul.f32 2.0, %v880_v27  ;;  %v1701_v27 = vld [vmem:[%s3952_s8 + $0x8] sm:$0xff]  ;;  %v2536_v37 = vshrl.u32 %v723_v17, 16  ;;  %v2618_v22 = vshrl.u32 %v1311_v58, 15 }
  0xe0   :  { %1967 = vmatpush.msra.mxu3 %v1701_v27  ;;  %1819 = vmatpush.msra.mxu2 %v1695_v35  ;;  %v71_v27 = vld [vmem:[%s3946_s1 + $0xf8] sm:$0xff] }
  0xe1   :  { %v944_v38 = vsel %vm848_vm13, %v912_v36, 0.0  ;;  %v1700_v36 = vld [vmem:[%s3952_s8] sm:$0xff]  ;;  %v819_v56 = vxor.u32 %v2536_v37, %v723_v17  ;;  %v472_v17 = vadd.s32 843314857, %v3271_v63 }
  0xe2   :  { %v228_v44 = vpop.f32.mrf.mxu0  ;;  %2565 = vmatmul.msk.f32.gmra.mxu1 %vm973_vm2, %v944_v38  ;;  %v597_v38 = vmul.u32 2146121005, %v565_v19  ;;  %1968 = vmatpush.msra.mxu3 %v1700_v36  ;;  %v408_v19 = vadd.s32 %v376_v4, %v2994_v15 }
  0xe3   :  { %v229_v51 = vadd.f32 %v3066_v3, %v228_v44  ;;  %v1184_v44 = vadd.s32 1686629714, %v3025_v29  ;;  %v566_v29 = vxor.u32 %v2475_v42, %v470_v23  ;;  %vm851_vm1 = vcmp.ge.s32.totalorder %v819_v56, 0 }
  0xe4   :  { %v2506_v57 = vshrl.u32 %v597_v38, 15  ;;  %v3284_v39 = vadd.s32 %v3005_v20, %v408_v19 }
  0xe5   :  { %v881_v55 = vmax.f32 %v229_v51, 0.0  ;;  %2454 = vmatmul.msk.f32.gmra.mxu0 %vm78_vm0, %v68_v46  ;;  %v471_v46 = vadd.s32 843314857, %v3251_v28  ;;  %v724_v51 = vmul.u32 2221713035, %v692_v32  ;;  %v2587_v60 = vshrl.u32 %v1184_v44, 16 }
  0xe6   :  { %v598_v9 = vmul.u32 2146121005, %v566_v29 }
  0xe7   :  { %v913_v62 = vmul.f32 2.0, %v881_v55  ;;  %v70_v55 = vld [vmem:[%s3946_s1 + $0xf0] sm:$0xff]  ;;  %v2537_v6 = vshrl.u32 %v724_v51, 16  ;;  %v1280_v11 = vxor.u32 %v2587_v60, %v1184_v44 }
  0xe8   :  { %v2507_v32 = vshrl.u32 %v598_v9, 15 }
  0xe9   :  { %v945_v8 = vsel %vm849_vm14, %v913_v62, 0.0  ;;  %v2476_v62 = vshrl.u32 %v471_v46, 16  ;;  %v820_v23 = vxor.u32 %v2537_v6, %v724_v51  ;;  %v1312_v35 = vmul.u32 2146121005, %v1280_v11 }
  0xea   :  { %v231_v13 = vpop.f32.mrf.mxu0  ;;  %2566 = vmatmul.msk.f32.gmra.mxu1 %vm973_vm2, %v945_v8  ;;  %v693_v8 = vxor.u32 %v2506_v57, %v597_v38  ;;  %v2477_v38 = vshrl.u32 %v472_v17, 16  ;;  %v694_v47 = vxor.u32 %v2507_v32, %v598_v9  ;;  %v473_v57 = vadd.s32 843314857, %v3284_v39  ;;  %v3296_v9 = vld [vmem:[%s3950_s5] ss:$0 sm:$0xff] }
  0xeb   :  { %v232_v25 = vadd.f32 %v3066_v3, %v231_v13  ;;  %v1185_v13 = vadd.s32 1686629714, %v3041_v41  ;;  %vm852_vm3 = vcmp.ge.s32.totalorder %v820_v23, 0  ;;  %v2619_v51 = vshrl.u32 %v1312_v35, 15 }
  0xec   :  { %v725_v30 = vmul.u32 2221713035, %v693_v8  ;;  %v568_v56 = vxor.u32 %v2477_v38, %v472_v17  ;;  %v2589_v6 = vshrl.u32 %v1186_v49, 16  ;;  %v1187_v32 = vadd.s32 1686629714, %v3061_v2 }
  0xed   :  { %v882_v31 = vmax.f32 %v232_v25, 0.0  ;;  %2455 = vmatmul.msk.f32.gmra.mxu0 %vm78_vm0, %v69_v16  ;;  %v567_v16 = vxor.u32 %v2476_v62, %v471_v46  ;;  %v310_v25 = vadd.s32 168, %v2991_v14  ;;  %v2588_v36 = vshrl.u32 %v1185_v13, 16 }
  0xee   :  { %v2538_v44 = vshrl.u32 %v725_v30, 16  ;;  %v1408_v8 = vxor.u32 %v2619_v51, %v1312_v35  ;;  %v600_v11 = vmul.u32 2146121005, %v568_v56 }
  0xef   :  { %v914_v43 = vmul.f32 2.0, %v882_v31  ;;  %v1407_v31 = vxor.u32 %v2618_v22, %v1311_v58  ;;  %v599_v37 = vmul.u32 2146121005, %v567_v16 }
  0xf0   :  { %v821_v62 = vxor.u32 %v2538_v44, %v725_v30  ;;  %v1440_v30 = vmul.u32 2221713035, %v1408_v8  ;;  %v312_v44 = vadd.s32 184, %v2991_v14 }
  0xf1   :  { %v946_v50 = vsel %vm850_vm15, %v914_v43, 0.0  ;;  %v377_v43 = vmul.u32 32, %v310_v25  ;;  %v1439_v46 = vmul.u32 2221713035, %v1407_v31  ;;  %v1282_v25 = vxor.u32 %v2589_v6, %v1186_v49 }
  0xf2   :  { %v234_v54 = vpop.f32.mrf.mxu0  ;;  %2567 = vmatmul.msk.f32.gmra.mxu1 %vm973_vm2, %v946_v50  ;;  %v2651_v51 = vshrl.u32 %v1440_v30, 16 }
  0xf3   :  { %v235_v59 = vadd.f32 %v3066_v3, %v234_v54  ;;  %v1281_v54 = vxor.u32 %v2588_v36, %v1185_v13  ;;  %v409_v29 = vadd.s32 %v377_v43, %v2994_v15  ;;  %v2650_v4 = vshrl.u32 %v1439_v46, 16 }
  0xf4   :  { %v2478_v13 = vshrl.u32 %v473_v57, 16  ;;  %v2509_v36 = vshrl.u32 %v600_v11, 15 }
  0xf5   :  { %v883_v5 = vmax.f32 %v235_v59, 0.0  ;;  %2456 = vmatmul.msk.f32.gmra.mxu0 %vm78_vm0, %v70_v55  ;;  %v2508_v55 = vshrl.u32 %v599_v37, 15  ;;  %v311_v59 = vadd.s32 176, %v2991_v14  ;;  %v1313_v22 = vmul.u32 2146121005, %v1281_v54 }
  0xf6   :  { %v3299_v17 = vadd.s32 %v3005_v20, %v409_v29 }
  0xf7   :  { %v915_v10 = vmul.f32 2.0, %v883_v5  ;;  %v726_v5 = vmul.u32 2221713035, %v694_v47  ;;  %v378_v19 = vmul.u32 32, %v311_v59  ;;  %v2620_v31 = vshrl.u32 %v1313_v22, 15 }
  0xf9   :  { %v947_v21 = vsel %vm851_vm1, %v915_v10, 0.0  ;;  %v695_v10 = vxor.u32 %v2508_v55, %v599_v37  ;;  %v2539_v23 = vshrl.u32 %v726_v5, 16  ;;  %v569_v37 = vxor.u32 %v2478_v13, %v473_v57 }
  0xfa   :  { %v237_v26 = vpop.f32.mrf.mxu0  ;;  %2568 = vmatmul.msk.f32.gmra.mxu1 %vm973_vm2, %v947_v21  ;;  %v1535_v21 = vxor.u32 %v2650_v4, %v1439_v46  ;;  %v410_v43 = vadd.s32 %v378_v19, %v2994_v15  ;;  %v1409_v54 = vxor.u32 %v2620_v31, %v1313_v22  ;;  %v2590_v55 = vshrl.u32 %v1187_v32, 16 }
  0xfb   :  { %v238_v41 = vadd.f32 %v3066_v3, %v237_v26  ;;  %v727_v35 = vmul.u32 2221713035, %v695_v10  ;;  %v822_v49 = vxor.u32 %v2539_v23, %v726_v5  ;;  %v601_v29 = vmul.u32 2146121005, %v569_v37 }
  0xfc   :  { %vm1567_vm4 = vcmp.ge.s32.totalorder %v1535_v21, 0  ;;  %v379_v4 = vmul.u32 32, %v312_v44  ;;  %v1188_v5 = vadd.s32 1686629714, %v3077_v18  ;;  %v1536_v22 = vxor.u32 %v2651_v51, %v1440_v30 }
  0xfd   :  { %v884_v42 = vmax.f32 %v238_v41, 0.0  ;;  %2457 = vmatmul.msk.f32.gmra.mxu0 %vm78_vm0, %v71_v27  ;;  %vm853_vm0 = vcmp.ge.s32.totalorder %v821_v62, 0  ;;  %v2540_v57 = vshrl.u32 %v727_v35, 16  ;;  %v3309_v62 = vadd.s32 %v3005_v20, %v410_v43 }
  0xfe   :  { %vm854_vm5 = vcmp.ge.s32.totalorder %v822_v49, 0  ;;  %v1283_v13 = vxor.u32 %v2590_v55, %v1187_v32  ;;  %v2510_v23 = vshrl.u32 %v601_v29, 15  ;;  %v411_v18 = vadd.s32 %v379_v4, %v2994_v15 }
  0xff   :  { %v916_v50 = vmul.f32 2.0, %v884_v42  ;;  %v474_v42 = vadd.s32 843314857, %v3299_v17  ;;  %v823_v19 = vxor.u32 %v2540_v57, %v727_v35  ;;  %v2591_v37 = vshrl.u32 %v1188_v5, 16 }
 0x100   :  { %v313_v30 = vadd.s32 192, %v2991_v14  ;;  %vm1568_vm6 = vcmp.ge.s32.totalorder %v1536_v22, 0  ;;  %v697_v44 = vxor.u32 %v2510_v23, %v601_v29  ;;  %v1189_v29 = vadd.s32 1686629714, %v3089_v40 }
 0x101   :  { %v948_v58 = vsel %vm852_vm3, %v916_v50, 0.0  ;;  %v1314_v50 = vmul.u32 2146121005, %v1282_v25  ;;  %vm855_vm7 = vcmp.ge.s32.totalorder %v823_v19, 0 }
 0x102   :  { %v240_v60 = vpop.f32.mrf.mxu0  ;;  %2569 = vmatmul.msk.f32.gmra.mxu1 %vm973_vm2, %v948_v58  ;;  %v696_v58 = vxor.u32 %v2509_v36, %v600_v11  ;;  %v1441_v11 = vmul.u32 2221713035, %v1409_v54  ;;  %v1284_v54 = vxor.u32 %v2591_v37, %v1188_v5  ;;  %v380_v55 = vmul.u32 32, %v313_v30 }
 0x103   :  { %v241_v52 = vadd.f32 %v3066_v3, %v240_v60  ;;  %v2479_v60 = vshrl.u32 %v474_v42, 16 }
 0x104   :  { %v728_v21 = vmul.u32 2221713035, %v696_v58  ;;  %v2652_v35 = vshrl.u32 %v1441_v11, 16  ;;  %v1316_v23 = vmul.u32 2146121005, %v1284_v54  ;;  %v412_v40 = vadd.s32 %v380_v55, %v2994_v15 }
 0x105   :  { %v885_v16 = vmax.f32 %v241_v52, 0.0  ;;  %v2621_v52 = vshrl.u32 %v1314_v50, 15 }
 0x106   :  { %v1537_v58 = vxor.u32 %v2652_v35, %v1441_v11  ;;  %v2623_v35 = vshrl.u32 %v1316_v23, 15 }
 0x107   :  { %v917_v26 = vmul.f32 2.0, %v885_v16  ;;  %v1087_v27 = vpop.f32.mrf.mxu1  ;;  %v1410_v36 = vxor.u32 %v2621_v52, %v1314_v50  ;;  %v314_v52 = vadd.s32 200, %v2991_v14 }
 0x108   :  { %v1088_v41 = vadd.f32 %v3296_v9, %v1087_v27  ;;  %v475_v27 = vadd.s32 843314857, %v3309_v62  ;;  %vm1569_vm8 = vcmp.ge.s32.totalorder %v1537_v58, 0 }
 0x109   :  { %v949_v38 = vsel %vm853_vm0, %v917_v26, 0.0  ;;  %v570_v26 = vxor.u32 %v2479_v60, %v474_v42  ;;  %v2541_v42 = vshrl.u32 %v728_v21, 16  ;;  %v1442_v50 = vmul.u32 2221713035, %v1410_v36 }
 0x10a   :  { %v1599_v46 = vmax.f32 %v1088_v41, 0.0  ;;  %v243_v47 = vpop.f32.mrf.mxu0  ;;  %2570 = vmatmul.msk.f32.gmra.mxu1 %vm973_vm2, %v949_v38  ;;  %v1315_v38 = vmul.u32 2146121005, %v1283_v13  ;;  %v2480_v49 = vshrl.u32 %v475_v27, 16 }
 0x10b   :  { %v244_v2 = vadd.f32 %v3066_v3, %v243_v47  ;;  %v602_v47 = vmul.u32 2146121005, %v570_v26  ;;  %v824_v4 = vxor.u32 %v2541_v42, %v728_v21  ;;  %v2653_v11 = vshrl.u32 %v1442_v50, 16 }
 0x10c   :  { %v1631_v56 = vmul.f32 2.0, %v1599_v46  ;;  %v2592_v26 = vshrl.u32 %v1189_v29, 16 }
 0x10d   :  { %v886_v59 = vmax.f32 %v244_v2, 0.0  ;;  %v3321_v2 = vadd.s32 %v3005_v20, %v411_v18  ;;  %v2511_v5 = vshrl.u32 %v602_v47, 15  ;;  %vm856_vm9 = vcmp.ge.s32.totalorder %v824_v4, 0 }
 0x10e   :  { %v1663_v6 = vsel %vm1567_vm4, %v1631_v56, 0.0 }
 0x10f   :  { %v918_v8 = vmul.f32 2.0, %v886_v59  ;;  %v1090_v10 = vpop.f32.mrf.mxu1  ;;  %2682 = vmatmul.msk.f32.vlgmr.msra.gmra.mxu2 %vm973_vm2, %v1663_v6  ;;  %2714 = vmatmul.msk.f32.vlgmr.msra.gmra.mxu3 %vm973_vm2, %v1663_v6  ;;  %v2622_v59 = vshrl.u32 %v1315_v38, 15  ;;  %v729_v6 = vmul.u32 2221713035, %v697_v44  ;;  %v476_v22 = vadd.s32 843314857, %v3321_v2 }
 0x110   :  { %v1091_v16 = vadd.f32 %v3296_v9, %v1090_v10  ;;  %v571_v10 = vxor.u32 %v2480_v49, %v475_v27 }
 0x111   :  { %v950_v25 = vsel %vm854_vm5, %v918_v8, 0.0  ;;  %v1411_v21 = vxor.u32 %v2622_v59, %v1315_v38  ;;  %v2542_v19 = vshrl.u32 %v729_v6, 16  ;;  %v2481_v37 = vshrl.u32 %v476_v22, 16 }
 0x112   :  { %v1600_v31 = vmax.f32 %v1091_v16, 0.0  ;;  %v246_v41 = vpop.f32.mrf.mxu0  ;;  %2571 = vmatmul.msk.f32.gmra.mxu1 %vm973_vm2, %v950_v25  ;;  %v603_v36 = vmul.u32 2146121005, %v571_v10  ;;  %v1285_v38 = vxor.u32 %v2592_v26, %v1189_v29  ;;  %v1412_v29 = vxor.u32 %v2623_v35, %v1316_v23 }
 0x113   :  { %v247_v32 = vadd.f32 %v3066_v3, %v246_v41  ;;  %v698_v41 = vxor.u32 %v2511_v5, %v602_v47  ;;  %v825_v49 = vxor.u32 %v2542_v19, %v729_v6  ;;  %v1191_v26 = vadd.s32 1686629714, %v3113_v24 }
 0x114   :  { %v1632_v43 = vmul.f32 2.0, %v1600_v31  ;;  %v381_v31 = vmul.u32 32, %v314_v52  ;;  %v1317_v52 = vmul.u32 2146121005, %v1285_v38 }
 0x115   :  { %v887_v46 = vmax.f32 %v247_v32, 0.0  ;;  %v1538_v32 = vxor.u32 %v2653_v11, %v1442_v50  ;;  %v315_v50 = vadd.s32 208, %v2991_v14  ;;  %v730_v55 = vmul.u32 2221713035, %v698_v41 }
 0x116   :  { %v1664_v51 = vsel %vm1568_vm6, %v1632_v43, 0.0  ;;  %v3334_v43 = vadd.s32 %v3005_v20, %v412_v40  ;;  %vm857_vm11 = vcmp.ge.s32.totalorder %v825_v49, 0 }
 0x117   :  { %v919_v56 = vmul.f32 2.0, %v887_v46  ;;  %v1093_v57 = vpop.f32.mrf.mxu1  ;;  %2683 = vmatmul.msk.f32.gmra.mxu2 %vm973_vm2, %v1664_v51  ;;  %2715 = vmatmul.msk.f32.gmra.mxu3 %vm973_vm2, %v1664_v51  ;;  %v1190_v46 = vadd.s32 1686629714, %v3101_v1  ;;  %v413_v51 = vadd.s32 %v381_v31, %v2994_v15  ;;  %vm1570_vm10 = vcmp.ge.s32.totalorder %v1538_v32, 0 }
 0x118   :  { %v1094_v60 = vadd.f32 %v3296_v9, %v1093_v57  ;;  %v572_v57 = vxor.u32 %v2481_v37, %v476_v22  ;;  %v477_v1 = vadd.s32 843314857, %v3334_v43  ;;  %v382_v22 = vmul.u32 32, %v315_v50 }
 0x119   :  { %v951_v8 = vsel %vm855_vm7, %v919_v56, 0.0  ;;  %v2512_v56 = vshrl.u32 %v603_v36, 15  ;;  %v3352_v10 = vadd.s32 %v3005_v20, %v413_v51  ;;  %v316_v32 = vadd.s32 216, %v2991_v14 }
 0x11a   :  { %v1601_v13 = vmax.f32 %v1094_v60, 0.0  ;;  %v249_v16 = vpop.f32.mrf.mxu0  ;;  %2572 = vmatmul.msk.f32.gmra.mxu1 %vm973_vm2, %v951_v8  ;;  %v3348_v60 = vld [vmem:[%s3947_s3] ss:$0 sm:$0xff]  ;;  %v2593_v8 = vshrl.u32 %v1190_v46, 16  ;;  %v604_v23 = vmul.u32 2146121005, %v572_v57 }
 0x11b   :  { %v250_v25 = vadd.f32 %v3066_v3, %v249_v16  ;;  %v1443_v3 = vmul.u32 2221713035, %v1411_v21  ;;  %v2543_v16 = vshrl.u32 %v730_v55, 16  ;;  %v699_v11 = vxor.u32 %v2512_v56, %v603_v36 }
 0x11c   :  { %v1633_v18 = vmul.f32 2.0, %v1601_v13  ;;  %v2482_v21 = vshrl.u32 %v477_v1, 16  ;;  %v1286_v41 = vxor.u32 %v2593_v8, %v1190_v46  ;;  %v478_v36 = vadd.s32 843314857, %v3352_v10 }
 0x11d   :  { %v888_v27 = vmax.f32 %v250_v25, 0.0  ;;  %v2654_v4 = vshrl.u32 %v1443_v3, 16  ;;  %v1444_v25 = vmul.u32 2221713035, %v1412_v29  ;;  %v826_v24 = vxor.u32 %v2543_v16, %v730_v55 }
 0x11e   :  { %v1665_v30 = vsel %vm1569_vm8, %v1633_v18, 0.0  ;;  %v573_v51 = vxor.u32 %v2482_v21, %v477_v1  ;;  %v2594_v46 = vshrl.u32 %v1191_v26, 16  ;;  %v1318_v56 = vmul.u32 2146121005, %v1286_v41 }
 0x11f   :  { %v920_v42 = vmul.f32 2.0, %v888_v27  ;;  %v1096_v44 = vpop.f32.mrf.mxu1  ;;  %2684 = vmatmul.msk.f32.gmra.mxu2 %vm973_vm2, %v1665_v30  ;;  %2716 = vmatmul.msk.f32.gmra.mxu3 %vm973_vm2, %v1665_v30  ;;  %v1539_v31 = vxor.u32 %v2654_v4, %v1443_v3  ;;  %v2624_v27 = vshrl.u32 %v1317_v52, 15  ;;  %v414_v30 = vadd.s32 %v382_v22, %v2994_v15 }
 0x120   :  { %v1097_v47 = vadd.f32 %v3296_v9, %v1096_v44  ;;  %v2513_v44 = vshrl.u32 %v604_v23, 15  ;;  %v2655_v3 = vshrl.u32 %v1444_v25, 16  ;;  %v383_v55 = vmul.u32 32, %v316_v32 }
 0x121   :  { %v952_v54 = vsel %vm856_vm9, %v920_v42, 0.0  ;;  %v731_v42 = vmul.u32 2221713035, %v699_v11  ;;  %vm1571_vm12 = vcmp.ge.s32.totalorder %v1539_v31, 0  ;;  %v3366_v49 = vadd.s32 %v3005_v20, %v414_v30 }
 0x122   :  { %v1602_v58 = vmax.f32 %v1097_v47, 0.0  ;;  %v252_v59 = vpop.f32.mrf.mxu0  ;;  %2573 = vmatmul.msk.f32.gmra.mxu1 %vm973_vm2, %v952_v54  ;;  %v1413_v54 = vxor.u32 %v2624_v27, %v1317_v52  ;;  %vm858_vm13 = vcmp.ge.s32.totalorder %v826_v24, 0  ;;  %v1540_v8 = vxor.u32 %v2655_v3, %v1444_v25 }
 0x123   :  { %v253_v6 = vadd.f32 %v3348_v60, %v252_v59  ;;  %v2544_v29 = vshrl.u32 %v731_v42, 16  ;;  %v1287_v1 = vxor.u32 %v2594_v46, %v1191_v26  ;;  %v2625_v16 = vshrl.u32 %v1318_v56, 15 }
 0x124   :  { %v1634_v5 = vmul.f32 2.0, %v1602_v58  ;;  %v2483_v58 = vshrl.u32 %v478_v36, 16  ;;  %v1445_v52 = vmul.u32 2221713035, %v1413_v54  ;;  %v1192_v11 = vadd.s32 1686629714, %v3125_v48 }
 0x125   :  { %v889_v13 = vmax.f32 %v253_v6, 0.0  ;;  %v700_v6 = vxor.u32 %v2513_v44, %v604_v23  ;;  %v415_v23 = vadd.s32 %v383_v55, %v2994_v15  ;;  %v827_v26 = vxor.u32 %v2544_v29, %v731_v42 }
 0x126   :  { %v1666_v40 = vsel %vm1570_vm10, %v1634_v5, 0.0  ;;  %v605_v5 = vmul.u32 2146121005, %v573_v51  ;;  %v574_v21 = vxor.u32 %v2483_v58, %v478_v36  ;;  %v317_v31 = vadd.s32 224, %v2991_v14 }
 0x127   :  { %v921_v18 = vmul.f32 2.0, %v889_v13  ;;  %v1099_v19 = vpop.f32.mrf.mxu1  ;;  %2685 = vmatmul.msk.f32.gmra.mxu2 %vm973_vm2, %v1666_v40  ;;  %2717 = vmatmul.msk.f32.gmra.mxu3 %vm973_vm2, %v1666_v40  ;;  %vm1572_vm14 = vcmp.ge.s32.totalorder %v1540_v8, 0  ;;  %v1319_v48 = vmul.u32 2146121005, %v1287_v1  ;;  %v2656_v36 = vshrl.u32 %v1445_v52, 16 }
 0x128   :  { %v1100_v37 = vadd.f32 %v3296_v9, %v1099_v19  ;;  %v732_v19 = vmul.u32 2221713035, %v700_v6  ;;  %v1414_v32 = vxor.u32 %v2625_v16, %v1318_v56  ;;  %v3379_v42 = vadd.s32 %v3005_v20, %v415_v23 }
 0x129   :  { %v953_v35 = vsel %vm857_vm11, %v921_v18, 0.0  ;;  %v479_v18 = vadd.s32 843314857, %v3366_v49  ;;  %vm859_vm15 = vcmp.ge.s32.totalorder %v827_v26, 0  ;;  %v384_v51 = vmul.u32 32, %v317_v31 }
 0x12a   :  { %v1603_v38 = vmax.f32 %v1100_v37, 0.0  ;;  %v255_v47 = vpop.f32.mrf.mxu0  ;;  %2574 = vmatmul.msk.f32.gmra.mxu1 %vm973_vm2, %v953_v35  ;;  %v2514_v37 = vshrl.u32 %v605_v5, 15  ;;  %v2595_v35 = vshrl.u32 %v1192_v11, 16  ;;  %v2545_v3 = vshrl.u32 %v732_v19, 16 }
 0x12b   :  { %v256_v50 = vadd.f32 %v3348_v60, %v255_v47  ;;  %v2484_v24 = vshrl.u32 %v479_v18, 16  ;;  %v2626_v54 = vshrl.u32 %v1319_v48, 15  ;;  %v1541_v56 = vxor.u32 %v2656_v36, %v1445_v52 }
 0x12c   :  { %v1635_v57 = vmul.f32 2.0, %v1603_v38  ;;  %v606_v38 = vmul.u32 2146121005, %v574_v21  ;;  %v1288_v29 = vxor.u32 %v2595_v35, %v1192_v11  ;;  %v480_v1 = vadd.s32 843314857, %v3379_v42 }
 0x12d   :  { %v890_v59 = vmax.f32 %v256_v50, 0.0  ;;  %v701_v50 = vxor.u32 %v2514_v37, %v605_v5  ;;  %v575_v8 = vxor.u32 %v2484_v24, %v479_v18  ;;  %v1415_v21 = vxor.u32 %v2626_v54, %v1319_v48 }
 0x12e   :  { %v1667_v4 = vsel %vm1571_vm12, %v1635_v57, 0.0  ;;  %v1193_v57 = vadd.s32 1686629714, %v3137_v7  ;;  %v416_v7 = vadd.s32 %v384_v51, %v2994_v15  ;;  %vm1573_vm1 = vcmp.ge.s32.totalorder %v1541_v56, 0 }
 0x12f   :  { %v922_v22 = vmul.f32 2.0, %v890_v59  ;;  %v1102_v13 = vpop.f32.mrf.mxu1  ;;  %2686 = vmatmul.msk.f32.gmra.mxu2 %vm973_vm2, %v1667_v4  ;;  %2718 = vmatmul.msk.f32.gmra.mxu3 %vm973_vm2, %v1667_v4  ;;  %v1446_v59 = vmul.u32 2221713035, %v1414_v32  ;;  %v2515_v4 = vshrl.u32 %v606_v38, 15  ;;  %v733_v52 = vmul.u32 2221713035, %v701_v50 }
 0x130   :  { %v1103_v40 = vadd.f32 %v3296_v9, %v1102_v13  ;;  %v318_v13 = vadd.s32 232, %v2991_v14  ;;  %v2596_v11 = vshrl.u32 %v1193_v57, 16  ;;  %v3392_v37 = vadd.s32 %v3005_v20, %v416_v7 }
 0x131   :  { %v954_v25 = vsel %vm858_vm13, %v922_v22, 0.0  ;;  %v828_v22 = vxor.u32 %v2545_v3, %v732_v19  ;;  %v2657_v18 = vshrl.u32 %v1446_v59, 16  ;;  %v702_v26 = vxor.u32 %v2515_v4, %v606_v38 }
 0x132   :  { %v1604_v27 = vmax.f32 %v1103_v40, 0.0  ;;  %v258_v41 = vpop.f32.mrf.mxu0  ;;  %2575 = vmatmul.msk.f32.gmra.mxu1 %vm973_vm2, %v954_v25  ;;  %v1320_v25 = vmul.u32 2146121005, %v1288_v29  ;;  %v2485_v19 = vshrl.u32 %v480_v1, 16  ;;  %v2546_v32 = vshrl.u32 %v733_v52, 16 }
 0x133   :  { %v259_v30 = vadd.f32 %v3348_v60, %v258_v41  ;;  %vm860_vm3 = vcmp.ge.s32.totalorder %v828_v22, 0  ;;  %v1447_v35 = vmul.u32 2221713035, %v1415_v21  ;;  %v1289_v48 = vxor.u32 %v2596_v11, %v1193_v57 }
 0x134   :  { %v1636_v44 = vmul.f32 2.0, %v1604_v27  ;;  %v607_v27 = vmul.u32 2146121005, %v575_v8  ;;  %v2627_v38 = vshrl.u32 %v1320_v25, 15  ;;  %v1194_v3 = vadd.s32 1686629714, %v3149_v34 }
 0x135   :  { %v891_v47 = vmax.f32 %v259_v30, 0.0  ;;  %v385_v30 = vmul.u32 32, %v318_v13  ;;  %v576_v54 = vxor.u32 %v2485_v19, %v480_v1  ;;  %v319_v56 = vadd.s32 240, %v2991_v14 }
 0x136   :  { %v1668_v46 = vsel %vm1572_vm14, %v1636_v44, 0.0  ;;  %v2516_v50 = vshrl.u32 %v607_v27, 15  ;;  %v2658_v4 = vshrl.u32 %v1447_v35, 16  ;;  %v1321_v34 = vmul.u32 2146121005, %v1289_v48 }
 0x137   :  { %v923_v58 = vmul.f32 2.0, %v891_v47  ;;  %v1105_v55 = vpop.f32.mrf.mxu1  ;;  %2687 = vmatmul.msk.f32.gmra.mxu2 %vm973_vm2, %v1668_v46  ;;  %2719 = vmatmul.msk.f32.gmra.mxu3 %vm973_vm2, %v1668_v46  ;;  %v1542_v47 = vxor.u32 %v2657_v18, %v1446_v59  ;;  %v734_v46 = vmul.u32 2221713035, %v702_v26  ;;  %v417_v57 = vadd.s32 %v385_v30, %v2994_v15 }
 0x138   :  { %v1106_v6 = vadd.f32 %v3296_v9, %v1105_v55  ;;  %v481_v55 = vadd.s32 843314857, %v3392_v37  ;;  %v829_v59 = vxor.u32 %v2546_v32, %v733_v52  ;;  %v2597_v1 = vshrl.u32 %v1194_v3, 16 }
 0x139   :  { %v955_v5 = vsel %vm859_vm15, %v923_v58, 0.0  ;;  %vm1574_vm0 = vcmp.ge.s32.totalorder %v1542_v47, 0  ;;  %v2547_v7 = vshrl.u32 %v734_v46, 16  ;;  %v703_v13 = vxor.u32 %v2516_v50, %v607_v27 }
 0x13a   :  { %v1605_v16 = vmax.f32 %v1106_v6, 0.0  ;;  %v261_v40 = vpop.f32.mrf.mxu0  ;;  %2576 = vmatmul.msk.f32.gmra.mxu1 %vm973_vm2, %v955_v5  ;;  %v1416_v5 = vxor.u32 %v2627_v38, %v1320_v25  ;;  %v2486_v21 = vshrl.u32 %v481_v55, 16  ;;  %v3405_v11 = vadd.s32 %v3005_v20, %v417_v57 }
 0x13b   :  { %v262_v23 = vadd.f32 %v3348_v60, %v261_v40  ;;  %vm861_vm4 = vcmp.ge.s32.totalorder %v829_v59, 0  ;;  %v1543_v52 = vxor.u32 %v2658_v4, %v1447_v35  ;;  %v1195_v27 = vadd.s32 1686629714, %v3161_v53 }
 0x13c   :  { %v1637_v31 = vmul.f32 2.0, %v1605_v16  ;;  %v608_v16 = vmul.u32 2146121005, %v576_v54  ;;  %v1448_v25 = vmul.u32 2221713035, %v1416_v5 }
 0x13d   :  { %v892_v41 = vmax.f32 %v262_v23, 0.0  ;;  %v386_v23 = vmul.u32 32, %v319_v56  ;;  %v735_v32 = vmul.u32 2221713035, %v703_v13  ;;  %v482_v35 = vadd.s32 843314857, %v3405_v11 }
 0x13e   :  { %v1669_v36 = vsel %vm1573_vm1, %v1637_v31, 0.0  ;;  %v2628_v31 = vshrl.u32 %v1321_v34, 15  ;;  %v2517_v48 = vshrl.u32 %v608_v16, 15  ;;  %vm1575_vm5 = vcmp.ge.s32.totalorder %v1543_v52, 0 }
 0x13f   :  { %v924_v44 = vmul.f32 2.0, %v892_v41  ;;  %v1108_v24 = vpop.f32.mrf.mxu1  ;;  %2688 = vmatmul.msk.f32.gmra.mxu2 %vm973_vm2, %v1669_v36  ;;  %2720 = vmatmul.msk.f32.gmra.mxu3 %vm973_vm2, %v1669_v36  ;;  %v1290_v41 = vxor.u32 %v2597_v1, %v1194_v3  ;;  %v830_v36 = vxor.u32 %v2547_v7, %v734_v46  ;;  %v418_v47 = vadd.s32 %v386_v23, %v2994_v15 }
 0x140   :  { %v1109_v51 = vadd.f32 %v3296_v9, %v1108_v24  ;;  %v577_v24 = vxor.u32 %v2486_v21, %v481_v55  ;;  %v1417_v50 = vxor.u32 %v2628_v31, %v1321_v34  ;;  %v320_v3 = vadd.s32 248, %v2991_v14 }
 0x141   :  { %v956_v58 = vsel %vm860_vm3, %v924_v44, 0.0  ;;  %v2659_v54 = vshrl.u32 %v1448_v25, 16  ;;  %v1322_v46 = vmul.u32 2146121005, %v1290_v41  ;;  %vm862_vm6 = vcmp.ge.s32.totalorder %v830_v36, 0 }
 0x142   :  { %v1606_v29 = vmax.f32 %v1109_v51, 0.0  ;;  %v264_v6 = vpop.f32.mrf.mxu0  ;;  %2577 = vmatmul.msk.f32.gmra.mxu1 %vm973_vm2, %v956_v58  ;;  %v2598_v58 = vshrl.u32 %v1195_v27, 16  ;;  %v2548_v55 = vshrl.u32 %v735_v32, 16  ;;  %v704_v56 = vxor.u32 %v2517_v48, %v608_v16 }
 0x143   :  { %v265_v8 = vadd.f32 %v3348_v60, %v264_v6  ;;  %v609_v6 = vmul.u32 2146121005, %v577_v24  ;;  %v2487_v59 = vshrl.u32 %v482_v35, 16  ;;  %v3417_v4 = vadd.s32 %v3005_v20, %v418_v47 }
 0x144   :  { %v1638_v22 = vmul.f32 2.0, %v1606_v29  ;;  %v1449_v5 = vmul.u32 2221713035, %v1417_v50  ;;  %v1196_v34 = vadd.s32 1686629714, %v3173_v12  ;;  %v387_v14 = vmul.u32 32, %v320_v3 }
 0x145   :  { %v893_v40 = vmax.f32 %v265_v8, 0.0  ;;  %v1544_v7 = vxor.u32 %v2659_v54, %v1448_v25  ;;  %v2629_v13 = vshrl.u32 %v1322_v46, 15  ;;  %v1291_v16 = vxor.u32 %v2598_v58, %v1195_v27 }
 0x146   :  { %v1670_v18 = vsel %vm1574_vm0, %v1638_v22, 0.0  ;;  %v831_v21 = vxor.u32 %v2548_v55, %v735_v32  ;;  %v736_v23 = vmul.u32 2221713035, %v704_v56  ;;  %v2518_v52 = vshrl.u32 %v609_v6, 15 }
 0x147   :  { %v925_v26 = vmul.f32 2.0, %v893_v40  ;;  %v1111_v19 = vpop.f32.mrf.mxu1  ;;  %2689 = vmatmul.msk.f32.gmra.mxu2 %vm973_vm2, %v1670_v18  ;;  %2721 = vmatmul.msk.f32.gmra.mxu3 %vm973_vm2, %v1670_v18  ;;  %v578_v31 = vxor.u32 %v2487_v59, %v482_v35  ;;  %v483_v12 = vadd.s32 843314857, %v3417_v4  ;;  %v2660_v41 = vshrl.u32 %v1449_v5, 16 }
 0x148   :  { %v1112_v30 = vadd.f32 %v3296_v9, %v1111_v19  ;;  %v419_v25 = vadd.s32 %v387_v14, %v2994_v15  ;;  %vm1576_vm7 = vcmp.ge.s32.totalorder %v1544_v7, 0  ;;  %v1418_v48 = vxor.u32 %v2629_v13, %v1322_v46 }
 0x149   :  { %v957_v44 = vsel %vm861_vm4, %v925_v26, 0.0  ;;  %v1323_v32 = vmul.u32 2146121005, %v1291_v16  ;;  %vm863_vm8 = vcmp.ge.s32.totalorder %v831_v21, 0  ;;  %v2549_v36 = vshrl.u32 %v736_v23, 16 }
 0x14a   :  { %v1607_v38 = vmax.f32 %v1112_v30, 0.0  ;;  %v267_v51 = vpop.f32.mrf.mxu0  ;;  %2578 = vmatmul.msk.f32.gmra.mxu1 %vm973_vm2, %v957_v44  ;;  %v2599_v30 = vshrl.u32 %v1196_v34, 16  ;;  %v705_v35 = vxor.u32 %v2518_v52, %v609_v6  ;;  %v610_v47 = vmul.u32 2146121005, %v578_v31 }
 0x14b   :  { %v268_v53 = vadd.f32 %v3348_v60, %v267_v51  ;;  %v1545_v50 = vxor.u32 %v2660_v41, %v1449_v5  ;;  %v1450_v46 = vmul.u32 2221713035, %v1418_v48  ;;  %v2630_v58 = vshrl.u32 %v1323_v32, 15 }
 0x14c   :  { %v1639_v57 = vmul.f32 2.0, %v1607_v38  ;;  %v2488_v38 = vshrl.u32 %v483_v12, 16  ;;  %v1292_v3 = vxor.u32 %v2599_v30, %v1196_v34  ;;  %v832_v56 = vxor.u32 %v2549_v36, %v736_v23 }
 0x14d   :  { %v894_v29 = vmax.f32 %v268_v53, 0.0  ;;  %v3429_v53 = vadd.s32 %v3005_v20, %v419_v25  ;;  %v737_v6 = vmul.u32 2221713035, %v705_v35  ;;  %v2519_v59 = vshrl.u32 %v610_v47, 15 }
 0x14e   :  { %v1671_v8 = vsel %vm1575_vm5, %v1639_v57, 0.0  ;;  %v1197_v57 = vadd.s32 1686629714, %v3185_v45  ;;  %vm1577_vm9 = vcmp.ge.s32.totalorder %v1545_v50, 0  ;;  %v1324_v34 = vmul.u32 2146121005, %v1292_v3 }
 0x14f   :  { %v926_v1 = vmul.f32 2.0, %v894_v29  ;;  %v1114_v22 = vpop.f32.mrf.mxu1  ;;  %2690 = vmatmul.msk.f32.gmra.mxu2 %vm973_vm2, %v1671_v8  ;;  %2722 = vmatmul.msk.f32.gmra.mxu3 %vm973_vm2, %v1671_v8  ;;  %v579_v8 = vxor.u32 %v2488_v38, %v483_v12  ;;  %v484_v14 = vadd.s32 843314857, %v3429_v53  ;;  %v1419_v45 = vxor.u32 %v2630_v58, %v1323_v32 }
 0x150   :  { %v1115_v40 = vadd.f32 %v3296_v9, %v1114_v22  ;;  %v2661_v22 = vshrl.u32 %v1450_v46, 16  ;;  %v2600_v7 = vshrl.u32 %v1197_v57, 16  ;;  %vm864_vm10 = vcmp.ge.s32.totalorder %v832_v56, 0 }
 0x151   :  { %v958_v18 = vsel %vm862_vm6, %v926_v1, 0.0  ;;  %v706_v21 = vxor.u32 %v2519_v59, %v610_v47  ;;  %v611_v23 = vmul.u32 2146121005, %v579_v8  ;;  %v2631_v52 = vshrl.u32 %v1324_v34, 15 }
 0x152   :  { %v1608_v26 = vmax.f32 %v1115_v40, 0.0  ;;  %v270_v19 = vpop.f32.mrf.mxu0  ;;  %2579 = vmatmul.msk.f32.gmra.mxu1 %vm973_vm2, %v958_v18  ;;  %v2550_v40 = vshrl.u32 %v737_v6, 16  ;;  %v2489_v31 = vshrl.u32 %v484_v14, 16  ;;  %v1198_v12 = vadd.s32 1686629714, %v3197_v0 }
 0x153   :  { %v271_v27 = vadd.f32 %v3348_v60, %v270_v19  ;;  %v1546_v41 = vxor.u32 %v2661_v22, %v1450_v46  ;;  %v1451_v30 = vmul.u32 2221713035, %v1419_v45  ;;  %v1293_v25 = vxor.u32 %v2600_v7, %v1197_v57 }
 0x154   :  { %v1640_v44 = vmul.f32 2.0, %v1608_v26  ;;  %v833_v32 = vxor.u32 %v2550_v40, %v737_v6  ;;  %v2520_v36 = vshrl.u32 %v611_v23, 15  ;;  %v1420_v0 = vxor.u32 %v2631_v52, %v1324_v34 }
 0x155   :  { %v895_v24 = vmax.f32 %v271_v27, 0.0  ;;  %v580_v47 = vxor.u32 %v2489_v31, %v484_v14  ;;  %v2601_v38 = vshrl.u32 %v1198_v12, 16  ;;  %vm1578_vm11 = vcmp.ge.s32.totalorder %v1546_v41, 0 }
 0x156   :  { %v1672_v51 = vsel %vm1576_vm7, %v1640_v44, 0.0  ;;  %v738_v44 = vmul.u32 2221713035, %v706_v21  ;;  %v2662_v50 = vshrl.u32 %v1451_v30, 16  ;;  %v1325_v3 = vmul.u32 2146121005, %v1293_v25 }
 0x157   :  { %v927_v54 = vmul.f32 2.0, %v895_v24  ;;  %v1117_v15 = vpop.f32.mrf.mxu1  ;;  %2691 = vmatmul.msk.f32.gmra.mxu2 %vm973_vm2, %v1672_v51  ;;  %2723 = vmatmul.msk.f32.gmra.mxu3 %vm973_vm2, %v1672_v51  ;;  %vm865_vm12 = vcmp.ge.s32.totalorder %v833_v32, 0  ;;  %v707_v58 = vxor.u32 %v2520_v36, %v611_v23  ;;  %v612_v56 = vmul.u32 2146121005, %v580_v47 }
 0x158   :  { %v1118_v55 = vadd.f32 %v3296_v9, %v1117_v15  ;;  %v2551_v46 = vshrl.u32 %v738_v44, 16  ;;  %v1547_v8 = vxor.u32 %v2662_v50, %v1451_v30  ;;  %v1200_v32 = vadd.s32 1686629714, %v3222_v61 }
 0x159   :  { %v959_v29 = vsel %vm863_vm8, %v927_v54, 0.0  ;;  %v739_v22 = vmul.u32 2221713035, %v707_v58  ;;  %vm1917_vm6 = vcmask 15360  }
 0x15a   :  { %v1609_v20 = vmax.f32 %v1118_v55, 0.0  ;;  %v273_v5 = vpop.f32.mrf.mxu0  ;;  %2580 = vmatmul.msk.f32.gmra.mxu1 %vm973_vm2, %v959_v29  ;;  %v1452_v55 = vmul.u32 2221713035, %v1420_v0  ;;  %v1294_v29 = vxor.u32 %v2601_v38, %v1198_v12  ;;  %vm1579_vm13 = vcmp.ge.s32.totalorder %v1547_v8, 0 }
 0x15b   :  { %v274_v1 = vadd.f32 %v3348_v60, %v273_v5  ;;  %v1199_v5 = vadd.s32 1686629714, %v3209_v33  ;;  %v2552_v33 = vshrl.u32 %v739_v22, 16 }
 0x15c   :  { %v1641_v13 = vmul.f32 2.0, %v1609_v20  ;;  %v2632_v20 = vshrl.u32 %v1325_v3, 15  ;;  %v1326_v40 = vmul.u32 2146121005, %v1294_v29 }
 0x15d   :  { %v896_v16 = vmax.f32 %v274_v1, 0.0  ;;  %v834_v1 = vxor.u32 %v2551_v46, %v738_v44 }
 0x15e   :  { %v1673_v18 = vsel %vm1577_vm9, %v1641_v13, 0.0  ;;  %v2663_v13 = vshrl.u32 %v1452_v55, 16  ;;  %v1421_v23 = vxor.u32 %v2632_v20, %v1325_v3  ;;  %v2633_v41 = vshrl.u32 %v1326_v40, 15 }
 0x15f   :  { %v928_v26 = vmul.f32 2.0, %v896_v16  ;;  %v1120_v19 = vpop.f32.mrf.mxu1  ;;  %2692 = vmatmul.msk.f32.gmra.mxu2 %vm973_vm2, %v1673_v18  ;;  %2724 = vmatmul.msk.f32.gmra.mxu3 %vm973_vm2, %v1673_v18  ;;  %v2521_v16 = vshrl.u32 %v612_v56, 15  ;;  %v2602_v18 = vshrl.u32 %v1199_v5, 16  ;;  %vm866_vm14 = vcmp.ge.s32.totalorder %v834_v1, 0 }
 0x160   :  { %v1121_v27 = vadd.f32 %v3296_v9, %v1120_v19  ;;  %v1422_v38 = vxor.u32 %v2633_v41, %v1326_v40 }
 0x161   :  { %v960_v48 = vsel %vm864_vm10, %v928_v26, 0.0  ;;  %v1548_v26 = vxor.u32 %v2663_v13, %v1452_v55  ;;  %v708_v19 = vxor.u32 %v2521_v16, %v612_v56  ;;  %v1201_v55 = vadd.s32 1686629714, %v3251_v28 }
 0x162   :  { %v1610_v24 = vmax.f32 %v1121_v27, 0.0  ;;  %v276_v35 = vpop.f32.mrf.mxu0  ;;  %2581 = vmatmul.msk.f32.gmra.mxu1 %vm973_vm2, %v960_v48  ;;  %v1453_v27 = vmul.u32 2221713035, %v1421_v23  ;;  %v1295_v48 = vxor.u32 %v2602_v18, %v1199_v5 }
 0x163   :  { %v277_v51 = vadd.f32 %v3348_v60, %v276_v35  ;;  %vm1580_vm15 = vcmp.ge.s32.totalorder %v1548_v26, 0  ;;  %v740_v47 = vmul.u32 2221713035, %v708_v19 }
 0x164   :  { %v1642_v54 = vmul.f32 2.0, %v1610_v24  ;;  %v835_v24 = vxor.u32 %v2552_v33, %v739_v22  ;;  %v2664_v50 = vshrl.u32 %v1453_v27, 16  ;;  %v1327_v3 = vmul.u32 2146121005, %v1295_v48 }
 0x165   :  { %v897_v15 = vmax.f32 %v277_v51, 0.0  ;;  %v2553_v58 = vshrl.u32 %v740_v47, 16 }
 0x166   :  { %v1674_v57 = vsel %vm1578_vm11, %v1642_v54, 0.0  ;;  %v2603_v54 = vshrl.u32 %v1200_v32, 16  ;;  %vm867_vm1 = vcmp.ge.s32.totalorder %v835_v24, 0 }
 0x167   :  { %v929_v6 = vmul.f32 2.0, %v897_v15  ;;  %v1123_v59 = vpop.f32.mrf.mxu1  ;;  %2693 = vmatmul.msk.f32.gmra.mxu2 %vm973_vm2, %v1674_v57  ;;  %2725 = vmatmul.msk.f32.gmra.mxu3 %vm973_vm2, %v1674_v57  ;;  %v1454_v57 = vmul.u32 2221713035, %v1422_v38  ;;  %v836_v1 = vxor.u32 %v2553_v58, %v740_v47 }
 0x168   :  { %v1124_v34 = vadd.f32 %v3296_v9, %v1123_v59  ;;  %v2634_v59 = vshrl.u32 %v1327_v3, 15  ;;  %v1296_v8 = vxor.u32 %v2603_v54, %v1200_v32 }
 0x169   :  { %v961_v14 = vsel %vm865_vm12, %v929_v6, 0.0  ;;  %v1549_v6 = vxor.u32 %v2664_v50, %v1453_v27  ;;  %v2665_v22 = vshrl.u32 %v1454_v57, 16  ;;  %vm868_vm0 = vcmp.ge.s32.totalorder %v836_v1, 0 }
 0x16a   :  { %v1611_v45 = vmax.f32 %v1124_v34, 0.0  ;;  %v279_v7 = vpop.f32.mrf.mxu0  ;;  %2582 = vmatmul.msk.f32.gmra.mxu1 %vm973_vm2, %v961_v14  ;;  %v1328_v13 = vmul.u32 2146121005, %v1296_v8 }
 0x16b   :  { %v280_v21 = vadd.f32 %v3348_v60, %v279_v7  ;;  %vm1581_vm3 = vcmp.ge.s32.totalorder %v1549_v6, 0  ;;  %v1423_v7 = vxor.u32 %v2634_v59, %v1327_v3  ;;  %v1550_v23 = vxor.u32 %v2665_v22, %v1454_v57 }
 0x16c   :  { %v1643_v52 = vmul.f32 2.0, %v1611_v45  ;;  %v2604_v45 = vshrl.u32 %v1201_v55, 16  ;;  %v2635_v33 = vshrl.u32 %v1328_v13, 15  ;;  %v1204_v57 = vadd.s32 1686629714, %v3299_v17 }
 0x16d   :  { %v898_v31 = vmax.f32 %v280_v21, 0.0  ;;  %vm1582_vm4 = vcmp.ge.s32.totalorder %v1550_v23, 0 }
 0x16e   :  { %v1675_v12 = vsel %vm1579_vm13, %v1643_v52, 0.0  ;;  %v1297_v18 = vxor.u32 %v2604_v45, %v1201_v55  ;;  %v1424_v27 = vxor.u32 %v2635_v33, %v1328_v13  ;;  %v2607_v1 = vshrl.u32 %v1204_v57, 16 }
 0x16f   :  { %v930_v30 = vmul.f32 2.0, %v898_v31  ;;  %v1126_v25 = vpop.f32.mrf.mxu1  ;;  %2694 = vmatmul.msk.f32.gmra.mxu2 %vm973_vm2, %v1675_v12  ;;  %2726 = vmatmul.msk.f32.gmra.mxu3 %vm973_vm2, %v1675_v12  ;;  %v1455_v31 = vmul.u32 2221713035, %v1423_v7  ;;  %v1202_v12 = vadd.s32 1686629714, %v3271_v63 }
 0x170   :  { %v1127_v44 = vadd.f32 %v3296_v9, %v1126_v25  ;;  %v1205_v13 = vadd.s32 1686629714, %v3309_v62 }
 0x171   :  { %v962_v36 = vsel %vm866_vm14, %v930_v30, 0.0  ;;  %v1329_v30 = vmul.u32 2146121005, %v1297_v18  ;;  %v2666_v25 = vshrl.u32 %v1455_v31, 16  ;;  %v2605_v48 = vshrl.u32 %v1202_v12, 16 }
 0x172   :  { %v1612_v35 = vmax.f32 %v1127_v44, 0.0  ;;  %v282_v0 = vpop.f32.mrf.mxu0  ;;  %2583 = vmatmul.msk.f32.gmra.mxu1 %vm973_vm2, %v962_v36  ;;  %v1203_v44 = vadd.s32 1686629714, %v3284_v39  ;;  %v1300_v18 = vxor.u32 %v2607_v1, %v1204_v57  ;;  %v2608_v33 = vshrl.u32 %v1205_v13, 16 }
 0x173   :  { %v283_v51 = vadd.f32 %v3348_v60, %v282_v0  ;;  %v2636_v36 = vshrl.u32 %v1329_v30, 15  ;;  %v1456_v0 = vmul.u32 2221713035, %v1424_v27  ;;  %v1298_v47 = vxor.u32 %v2605_v48, %v1202_v12 }
 0x174   :  { %v1644_v15 = vmul.f32 2.0, %v1612_v35  ;;  %v1551_v35 = vxor.u32 %v2666_v25, %v1455_v31  ;;  %v1332_v25 = vmul.u32 2146121005, %v1300_v18  ;;  %v1207_v1 = vadd.s32 1686629714, %v3334_v43 }
 0x175   :  { %v899_v46 = vmax.f32 %v283_v51, 0.0  ;;  %v2606_v51 = vshrl.u32 %v1203_v44, 16  ;;  %v1425_v3 = vxor.u32 %v2636_v36, %v1329_v30  ;;  %v2667_v54 = vshrl.u32 %v1456_v0, 16 }
 0x176   :  { %v1676_v61 = vsel %vm1580_vm15, %v1644_v15, 0.0  ;;  %vm1583_vm5 = vcmp.ge.s32.totalorder %v1551_v35, 0  ;;  %v1330_v15 = vmul.u32 2146121005, %v1298_v47  ;;  %v1206_v36 = vadd.s32 1686629714, %v3321_v2 }
 0x177   :  { %v931_v56 = vmul.f32 2.0, %v899_v46  ;;  %v1129_v29 = vpop.f32.mrf.mxu1  ;;  %2695 = vmatmul.msk.f32.gmra.mxu2 %vm973_vm2, %v1676_v61  ;;  %2727 = vmatmul.msk.f32.gmra.mxu3 %vm973_vm2, %v1676_v61  ;;  %v1299_v39 = vxor.u32 %v2606_v51, %v1203_v44  ;;  %v1457_v58 = vmul.u32 2221713035, %v1425_v3  ;;  %v1552_v6 = vxor.u32 %v2667_v54, %v1456_v0 }
 0x178   :  { %v1130_v20 = vadd.f32 %v3296_v9, %v1129_v29  ;;  %v3489_v29 = vld [vmem:[%s3954_s9] ss:$0 sm:$0xff]  ;;  %v2637_v59 = vshrl.u32 %v1330_v15, 15  ;;  %v2639_v47 = vshrl.u32 %v1332_v25, 15  ;;  %v2609_v54 = vshrl.u32 %v1206_v36, 16 }
 0x179   :  { %v963_v5 = vsel %vm867_vm1, %v931_v56, 0.0  ;;  %v3484_v56 = vld [vmem:[%s3953_s7] ss:$0 sm:$0xff]  ;;  %v1331_v17 = vmul.u32 2146121005, %v1299_v39  ;;  %vm1584_vm7 = vcmp.ge.s32.totalorder %v1552_v6, 0 }
 0x17a   :  { %v1613_v34 = vmax.f32 %v1130_v20, 0.0  ;;  %v285_v14 = vpop.f32.mrf.mxu0  ;;  %2584 = vmatmul.msk.f32.gmra.mxu1 %vm973_vm2, %v963_v5  ;;  %v1428_v6 = vxor.u32 %v2639_v47, %v1332_v25 }
 0x17b   :  { %v286_v28 = vadd.f32 %v3348_v60, %v285_v14  ;;  %v3470_v60 = vld [vmem:[%s3950_s5] ss:$0 sm:$0xff]  ;;  %v2668_v14 = vshrl.u32 %v1457_v58, 16 }
 0x17c   :  { %v1645_v16 = vmul.f32 2.0, %v1613_v34 }
 0x17d   :  { %v900_v40 = vmax.f32 %v286_v28, 0.0  ;;  %v1426_v28 = vxor.u32 %v2637_v59, %v1330_v15  ;;  %v1553_v23 = vxor.u32 %v2668_v14, %v1457_v58 }
 0x17e   :  { %v1677_v21 = vsel %vm1581_vm3, %v1645_v16, 0.0 }
 0x17f   :  { %v932_v9 = vmul.f32 2.0, %v900_v40  ;;  %v1132_v52 = vpop.f32.mrf.mxu1  ;;  %2696 = vmatmul.msk.f32.gmra.mxu2 %vm973_vm2, %v1677_v21  ;;  %2728 = vmatmul.msk.f32.gmra.mxu3 %vm973_vm2, %v1677_v21  ;;  %v2638_v40 = vshrl.u32 %v1331_v17, 15  ;;  %v1458_v31 = vmul.u32 2221713035, %v1426_v28  ;;  %vm1585_vm8 = vcmp.ge.s32.totalorder %v1553_v23, 0 }
 0x180   :  { %v1133_v26 = vadd.f32 %v3470_v60, %v1132_v52  ;;  %v1460_v28 = vmul.u32 2221713035, %v1428_v6 }
 0x181   :  { %v964_v19 = vsel %vm868_vm0, %v932_v9, 0.0 }
 0x182   :  { %v1614_v41 = vmax.f32 %v1133_v26, 0.0  ;;  %2585 = vmatmul.msk.f32.gmra.mxu1 %vm973_vm2, %v964_v19  ;;  %v1427_v26 = vxor.u32 %v2638_v40, %v1331_v17 }
 0x184   :  { %v1646_v32 = vmul.f32 2.0, %v1614_v41  ;;  %v1459_v35 = vmul.u32 2221713035, %v1427_v26  ;;  %v2671_v26 = vshrl.u32 %v1460_v28, 16 }
 0x186   :  { %v1678_v63 = vsel %vm1582_vm4, %v1646_v32, 0.0  ;;  %v2669_v32 = vshrl.u32 %v1458_v31, 16  ;;  %v2670_v39 = vshrl.u32 %v1459_v35, 16 }
 0x187   :  { %v1135_v24 = vpop.f32.mrf.mxu1  ;;  %2697 = vmatmul.msk.f32.gmra.mxu2 %vm973_vm2, %v1678_v63  ;;  %2729 = vmatmul.msk.f32.gmra.mxu3 %vm973_vm2, %v1678_v63  ;;  %v1301_v63 = vxor.u32 %v2608_v33, %v1205_v13 }
 0x188   :  { %v1136_v38 = vadd.f32 %v3470_v60, %v1135_v24  ;;  %v1555_v14 = vxor.u32 %v2670_v39, %v1459_v35  ;;  %v1556_v35 = vxor.u32 %v2671_v26, %v1460_v28 }
 0x189   :  { %v1333_v2 = vmul.u32 2146121005, %v1301_v63 }
 0x18a   :  { %v1615_v50 = vmax.f32 %v1136_v38, 0.0  ;;  %vm1587_vm10 = vcmp.ge.s32.totalorder %v1555_v14, 0  ;;  %vm1588_vm11 = vcmp.ge.s32.totalorder %v1556_v35, 0 }
 0x18c   :  { %v1647_v46 = vmul.f32 2.0, %v1615_v50  ;;  %v1554_v50 = vxor.u32 %v2669_v32, %v1458_v31 }
 0x18e   :  { %v1679_v61 = vsel %vm1583_vm5, %v1647_v46, 0.0  ;;  %vm1586_vm9 = vcmp.ge.s32.totalorder %v1554_v50, 0 }
 0x18f   :  { %v1138_v55 = vpop.f32.mrf.mxu1  ;;  %2698 = vmatmul.msk.f32.gmra.mxu2 %vm973_vm2, %v1679_v61  ;;  %2730 = vmatmul.msk.f32.gmra.mxu3 %vm973_vm2, %v1679_v61 }
 0x190   :  { %v1139_v8 = vadd.f32 %v3470_v60, %v1138_v55 }
 0x192   :  { %v1616_v20 = vmax.f32 %v1139_v8, 0.0  ;;  %v1821_v5 = vpop.f32.mrf.mxu2  ;;  %v1970_v34 = vpop.f32.mrf.mxu3 }
 0x193   :  { %v1822_v22 = vadd.f32 %v3484_v56, %v1821_v5  ;;  %v3494_v45 = vadd.f32 %v3489_v29, %v1970_v34  ;;  %v1302_v5 = vxor.u32 %v2609_v54, %v1206_v36  ;;  %v1208_v36 = vadd.s32 1686629714, %v3352_v10 }
 0x194   :  { %v1648_v7 = vmul.f32 2.0, %v1616_v20  ;;  %v2640_v20 = vshrl.u32 %v1333_v2, 15 }
 0x195   :  { %1918 = vst.msk [vmem:[%s3955_s10] sm:$0xff] %vm1917_vm6, %v1822_v22  ;;  %v2098_v16 = vand.u32 2147483647, %v3494_v45  ;;  %v2066_v31 = vmax.f32 %v3494_v45, 0.0 }
 0x196   :  { %v1680_v21 = vsel %vm1584_vm7, %v1648_v7, 0.0  ;;  %v1429_v40 = vxor.u32 %v2640_v20, %v1333_v2 }
 0x197   :  { %v2130_v9 = vsub.f32 0.0, %v2098_v16  ;;  %v1141_v52 = vpop.f32.mrf.mxu1  ;;  %2699 = vmatmul.msk.f32.gmra.mxu2 %vm973_vm2, %v1680_v21  ;;  %2731 = vmatmul.msk.f32.gmra.mxu3 %vm973_vm2, %v1680_v21  ;;  %v1334_v21 = vmul.u32 2146121005, %v1302_v5 }
 0x198   :  { %v1142_v62 = vadd.f32 %v3470_v60, %v1141_v52 }
 0x199   :  { %v2162_v12 = vmul.f32 1.442695, %v2130_v9  ;;  %v2610_v9 = vshrl.u32 %v1207_v1, 16  ;;  %v2641_v32 = vshrl.u32 %v1334_v21, 15 }
 0x19a   :  { %v1617_v19 = vmax.f32 %v1142_v62, 0.0  ;;  %v1824_v41 = vpop.f32.mrf.mxu2  ;;  %v1973_v30 = vpop.f32.mrf.mxu3 }
 0x19b   :  { %2750 = vpow2.f32 %v2162_v12  ;;  %v1825_v27 = vadd.f32 %v3484_v56, %v1824_v41  ;;  %v3507_v48 = vadd.f32 %v3489_v29, %v1973_v30  ;;  %v1303_v63 = vxor.u32 %v2610_v9, %v1207_v1 }
 0x19c   :  { %v1649_v44 = vmul.f32 2.0, %v1617_v19 }
 0x19d   :  { %1919 = vst.msk [vmem:[%s3955_s10 + $0x8] sm:$0xff] %vm1917_vm6, %v1825_v27  ;;  %v2099_v24 = vand.u32 2147483647, %v3507_v48  ;;  %v1461_v27 = vmul.u32 2221713035, %v1429_v40  ;;  %v2067_v39 = vmax.f32 %v3507_v48, 0.0 }
 0x19e   :  { %v1681_v0 = vsel %vm1585_vm8, %v1649_v44, 0.0  ;;  %v1335_v54 = vmul.u32 2146121005, %v1303_v63 }
 0x19f   :  { %v2131_v38 = vsub.f32 0.0, %v2099_v24  ;;  %v1144_v51 = vpop.f32.mrf.mxu1  ;;  %2700 = vmatmul.msk.f32.gmra.mxu2 %vm973_vm2, %v1681_v0  ;;  %2732 = vmatmul.msk.f32.gmra.mxu3 %vm973_vm2, %v1681_v0  ;;  %v2672_v50 = vshrl.u32 %v1461_v27, 16 }
 0x1a0   :  { %v1145_v3 = vadd.f32 %v3470_v60, %v1144_v51  ;;  %v2642_v1 = vshrl.u32 %v1335_v54, 15 }
 0x1a1   :  { %v2751_v15 = vpop.eup %2750  ;;  %v2164_v46 = vmul.f32 1.442695, %v2131_v38  ;;  %v1557_v5 = vxor.u32 %v2672_v50, %v1461_v27 }
 0x1a2   :  { %v2226_v61 = vadd.f32 1.0, %v2751_v15  ;;  %v1618_v58 = vmax.f32 %v1145_v3, 0.0  ;;  %v1827_v57 = vpop.f32.mrf.mxu2  ;;  %v1976_v55 = vpop.f32.mrf.mxu3  ;;  %v1430_v3 = vxor.u32 %v2641_v32, %v1334_v21  ;;  %v2611_v15 = vshrl.u32 %v1208_v36, 16 }
 0x1a3   :  { %2752 = vpow2.f32 %v2164_v46  ;;  %v1828_v59 = vadd.f32 %v3484_v56, %v1827_v57  ;;  %v3520_v8 = vadd.f32 %v3489_v29, %v1976_v55  ;;  %vm1589_vm12 = vcmp.ge.s32.totalorder %v1557_v5, 0 }
 0x1a4   :  { %2754 = vlog2.f32 %v2226_v61  ;;  %v1650_v17 = vmul.f32 2.0, %v1618_v58 }
 0x1a5   :  { %1920 = vst.msk [vmem:[%s3955_s10 + $0x10] sm:$0xff] %vm1917_vm6, %v1828_v59  ;;  %v2100_v34 = vand.u32 2147483647, %v3520_v8 }
 0x1a6   :  { %v1682_v22 = vsel %vm1586_vm9, %v1650_v17, 0.0 }
 0x1a7   :  { %v2132_v7 = vsub.f32 0.0, %v2100_v34  ;;  %v1147_v13 = vpop.f32.mrf.mxu1  ;;  %2701 = vmatmul.msk.f32.gmra.mxu2 %vm973_vm2, %v1682_v22  ;;  %2733 = vmatmul.msk.f32.gmra.mxu3 %vm973_vm2, %v1682_v22  ;;  %v1462_v34 = vmul.u32 2221713035, %v1430_v3  ;;  %v1304_v22 = vxor.u32 %v2611_v15, %v1208_v36 }
 0x1a8   :  { %v1148_v16 = vadd.f32 %v3470_v60, %v1147_v13 }
 0x1a9   :  { %v2753_v23 = vpop.eup %2752  ;;  %v2166_v18 = vmul.f32 1.442695, %v2132_v7  ;;  %v1209_v7 = vadd.s32 1686629714, %v3366_v49  ;;  %v1336_v49 = vmul.u32 2146121005, %v1304_v22 }
 0x1aa   :  { %v2755_v52 = vpop.eup %2754  ;;  %v2227_v43 = vadd.f32 1.0, %v2753_v23  ;;  %v1619_v62 = vmax.f32 %v1148_v16, 0.0  ;;  %v1830_v33 = vpop.f32.mrf.mxu2  ;;  %v2673_v23 = vshrl.u32 %v1462_v34, 16 }
 0x1ab   :  { %v1979_v12 = vpop.f32.mrf.mxu3  ;;  %v2259_v19 = vmul.f32 0.6931472, %v2755_v52  ;;  %2756 = vpow2.f32 %v2166_v18  ;;  %v1831_v41 = vadd.f32 %v3484_v56, %v1830_v33  ;;  %v1431_v52 = vxor.u32 %v2642_v1, %v1335_v54 }
 0x1ac   :  { %v3534_v30 = vadd.f32 %v3489_v29, %v1979_v12  ;;  %2758 = vlog2.f32 %v2227_v43  ;;  %v1651_v25 = vmul.f32 2.0, %v1619_v62  ;;  %v2068_v43 = vmax.f32 %v3520_v8, 0.0 }
 0x1ad   :  { %v2322_v44 = vadd.f32 %v2259_v19, %v2066_v31  ;;  %1921 = vst.msk [vmem:[%s3955_s10 + $0x18] sm:$0xff] %vm1917_vm6, %v1831_v41  ;;  %v2612_v19 = vshrl.u32 %v1209_v7, 16  ;;  %v1463_v36 = vmul.u32 2221713035, %v1431_v52 }
 0x1ae   :  { %v2101_v45 = vand.u32 2147483647, %v3534_v30  ;;  %v1683_v24 = vsel %vm1587_vm10, %v1651_v25, 0.0 }
 0x1af   :  { %v2354_v0 = vadd.f32 1e-06, %v2322_v44  ;;  %v1150_v38 = vpop.f32.mrf.mxu1  ;;  %2702 = vmatmul.msk.f32.gmra.mxu2 %vm973_vm2, %v1683_v24  ;;  %2734 = vmatmul.msk.f32.gmra.mxu3 %vm973_vm2, %v1683_v24  ;;  %v1558_v44 = vxor.u32 %v2673_v23, %v1462_v34  ;;  %v2643_v24 = vshrl.u32 %v1336_v49, 15 }
 0x1b0   :  { %v2133_v47 = vsub.f32 0.0, %v2101_v45  ;;  %v1151_v51 = vadd.f32 %v3470_v60, %v1150_v38  ;;  %v1210_v45 = vadd.s32 1686629714, %v3379_v42 }
 0x1b1   :  { %v2757_v2 = vpop.eup %2756  ;;  %2386 = vst.msk [vmem:[%s3956_s11] sm:$0xff] %vm1917_vm6, %v2354_v0  ;;  %v1305_v0 = vxor.u32 %v2612_v19, %v1209_v7  ;;  %vm1590_vm13 = vcmp.ge.s32.totalorder %v1558_v44, 0  ;;  %v1432_v54 = vxor.u32 %v2643_v24, %v1336_v49 }
 0x1b2   :  { %v2168_v10 = vmul.f32 1.442695, %v2133_v47  ;;  %v2759_v46 = vpop.eup %2758  ;;  %v2228_v61 = vadd.f32 1.0, %v2757_v2  ;;  %v1620_v58 = vmax.f32 %v1151_v51, 0.0  ;;  %v1833_v57 = vpop.f32.mrf.mxu2  ;;  %v2613_v50 = vshrl.u32 %v1210_v45, 16 }
 0x1b3   :  { %v1982_v55 = vpop.f32.mrf.mxu3  ;;  %v2261_v6 = vmul.f32 0.6931472, %v2759_v46  ;;  %v1834_v59 = vadd.f32 %v3484_v56, %v1833_v57  ;;  %v2069_v46 = vmax.f32 %v3534_v30, 0.0  ;;  %v1464_v22 = vmul.u32 2221713035, %v1432_v54 }
 0x1b4   :  { %2760 = vpow2.f32 %v2168_v10  ;;  %v3553_v17 = vadd.f32 %v3489_v29, %v1982_v55  ;;  %v1652_v20 = vmul.f32 2.0, %v1620_v58  ;;  %v2674_v10 = vshrl.u32 %v1463_v36, 16 }
 0x1b5   :  { %2762 = vlog2.f32 %v2228_v61  ;;  %v2323_v14 = vadd.f32 %v2261_v6, %v2067_v39  ;;  %1922 = vst.msk [vmem:[%s3955_s10 + $0x20] sm:$0xff] %vm1917_vm6, %v1834_v59  ;;  %v1337_v55 = vmul.u32 2146121005, %v1305_v0  ;;  %v1306_v34 = vxor.u32 %v2613_v50, %v1210_v45 }
 0x1b6   :  { %v2102_v48 = vand.u32 2147483647, %v3553_v17  ;;  %v1684_v28 = vsel %vm1588_vm11, %v1652_v20, 0.0  ;;  %v1559_v1 = vxor.u32 %v2674_v10, %v1463_v36  ;;  %v2675_v52 = vshrl.u32 %v1464_v22, 16 }
 0x1b7   :  { %v2355_v13 = vadd.f32 1e-06, %v2323_v14  ;;  %v1153_v40 = vpop.f32.mrf.mxu1  ;;  %2703 = vmatmul.msk.f32.gmra.mxu2 %vm973_vm2, %v1684_v28  ;;  %2735 = vmatmul.msk.f32.gmra.mxu3 %vm973_vm2, %v1684_v28  ;;  %v1211_v14 = vadd.s32 1686629714, %v3392_v37  ;;  %v2644_v7 = vshrl.u32 %v1337_v55, 15 }
 0x1b8   :  { %v2134_v16 = vsub.f32 0.0, %v2102_v48  ;;  %v1154_v21 = vadd.f32 %v3470_v60, %v1153_v40  ;;  %vm1591_vm14 = vcmp.ge.s32.totalorder %v1559_v1, 0  ;;  %v1212_v36 = vadd.s32 1686629714, %v3405_v11 }
 0x1b9   :  { %2387 = vst.msk [vmem:[%s3956_s11 + $0x8] sm:$0xff] %vm1917_vm6, %v2355_v13  ;;  %v2614_v23 = vshrl.u32 %v1211_v14, 16 }
 0x1ba   :  { %v2761_v18 = vpop.eup %2760  ;;  %v2170_v9 = vmul.f32 1.442695, %v2134_v16  ;;  %v1621_v33 = vmax.f32 %v1154_v21, 0.0  ;;  %v1836_v12 = vpop.f32.mrf.mxu2  ;;  %v1338_v21 = vmul.u32 2146121005, %v1306_v34 }
 0x1bb   :  { %v2763_v31 = vpop.eup %2762  ;;  %v2229_v62 = vadd.f32 1.0, %v2761_v18  ;;  %v1985_v26 = vpop.f32.mrf.mxu3  ;;  %v1837_v25 = vadd.f32 %v3484_v56, %v1836_v12  ;;  %v1307_v45 = vxor.u32 %v2614_v23, %v1211_v14 }
 0x1bc   :  { %v2263_v41 = vmul.f32 0.6931472, %v2763_v31  ;;  %2764 = vpow2.f32 %v2170_v9  ;;  %v3571_v27 = vadd.f32 %v3489_v29, %v1985_v26  ;;  %v1653_v32 = vmul.f32 2.0, %v1621_v33 }
 0x1bd   :  { %2766 = vlog2.f32 %v2229_v62  ;;  %1923 = vst.msk [vmem:[%s3955_s10 + $0x28] sm:$0xff] %vm1917_vm6, %v1837_v25  ;;  %v2070_v31 = vmax.f32 %v3553_v17, 0.0  ;;  %v1433_v26 = vxor.u32 %v2644_v7, %v1337_v55  ;;  %v2645_v44 = vshrl.u32 %v1338_v21, 15 }
 0x1be   :  { %v2324_v63 = vadd.f32 %v2263_v41, %v2068_v43  ;;  %v2103_v8 = vand.u32 2147483647, %v3571_v27  ;;  %v1685_v35 = vsel %vm1589_vm12, %v1653_v32, 0.0  ;;  %v1339_v50 = vmul.u32 2146121005, %v1307_v45 }
 0x1bf   :  { %v1156_v51 = vpop.f32.mrf.mxu1  ;;  %2704 = vmatmul.msk.f32.gmra.mxu2 %vm973_vm2, %v1685_v35  ;;  %2736 = vmatmul.msk.f32.gmra.mxu3 %vm973_vm2, %v1685_v35  ;;  %v1465_v35 = vmul.u32 2221713035, %v1433_v26  ;;  %v2071_v54 = vmax.f32 %v3571_v27, 0.0 }
 0x1c0   :  { %v2356_v47 = vadd.f32 1e-06, %v2324_v63  ;;  %v2135_v38 = vsub.f32 0.0, %v2103_v8  ;;  %v1157_v42 = vadd.f32 %v3470_v60, %v1156_v51  ;;  %v1560_v8 = vxor.u32 %v2675_v52, %v1464_v22 }
 0x1c1   :  { %v2646_v34 = vshrl.u32 %v1339_v50, 15 }
 0x1c2   :  { %v2765_v3 = vpop.eup %2764  ;;  %2388 = vst.msk [vmem:[%s3956_s11 + $0x10] sm:$0xff] %vm1917_vm6, %v2356_v47  ;;  %v2172_v2 = vmul.f32 1.442695, %v2135_v38  ;;  %v1622_v61 = vmax.f32 %v1157_v42, 0.0  ;;  %v1839_v58 = vpop.f32.mrf.mxu2  ;;  %v1434_v42 = vxor.u32 %v2645_v44, %v1338_v21  ;;  %vm1592_vm15 = vcmp.ge.s32.totalorder %v1560_v8, 0 }
 0x1c3   :  { %v2767_v15 = vpop.eup %2766  ;;  %v2230_v39 = vadd.f32 1.0, %v2765_v3  ;;  %v1988_v57 = vpop.f32.mrf.mxu3  ;;  %v1840_v59 = vadd.f32 %v3484_v56, %v1839_v58  ;;  %v2676_v58 = vshrl.u32 %v1465_v35, 16  ;;  %v1214_v8 = vadd.s32 1686629714, %v3429_v53 }
 0x1c4   :  { %v2265_v6 = vmul.f32 0.6931472, %v2767_v15  ;;  %2768 = vpow2.f32 %v2172_v2  ;;  %v3590_v20 = vadd.f32 %v3489_v29, %v1988_v57  ;;  %v1654_v5 = vmul.f32 2.0, %v1622_v61 }
 0x1c5   :  { %2770 = vlog2.f32 %v2230_v39  ;;  %1924 = vst.msk [vmem:[%s3955_s10 + $0x30] sm:$0xff] %vm1917_vm6, %v1840_v59  ;;  %v2615_v2 = vshrl.u32 %v1212_v36, 16  ;;  %v1561_v22 = vxor.u32 %v2676_v58, %v1465_v35 }
 0x1c6   :  { %v2325_v48 = vadd.f32 %v2265_v6, %v2069_v46  ;;  %v2104_v30 = vand.u32 2147483647, %v3590_v20  ;;  %v1686_v28 = vsel %vm1590_vm13, %v1654_v5, 0.0  ;;  %v1466_v5 = vmul.u32 2221713035, %v1434_v42 }
 0x1c7   :  { %v1159_v40 = vpop.f32.mrf.mxu1  ;;  %2705 = vmatmul.msk.f32.gmra.mxu2 %vm973_vm2, %v1686_v28  ;;  %2737 = vmatmul.msk.f32.gmra.mxu3 %vm973_vm2, %v1686_v28  ;;  %v2072_v52 = vmax.f32 %v3590_v20, 0.0  ;;  %vm1593_vm1 = vcmp.ge.s32.totalorder %v1561_v22, 0 }
 0x1c8   :  { %v2357_v13 = vadd.f32 1e-06, %v2325_v48  ;;  %v2136_v16 = vsub.f32 0.0, %v2104_v30  ;;  %v1160_v37 = vadd.f32 %v3470_v60, %v1159_v40  ;;  %v1308_v48 = vxor.u32 %v2615_v2, %v1212_v36 }
 0x1c9   :  { %v1213_v30 = vadd.s32 1686629714, %v3417_v4  ;;  %v2677_v40 = vshrl.u32 %v1466_v5, 16 }
 0x1ca   :  { %v2769_v18 = vpop.eup %2768  ;;  %2389 = vst.msk [vmem:[%s3956_s11 + $0x18] sm:$0xff] %vm1917_vm6, %v2357_v13  ;;  %v2174_v9 = vmul.f32 1.442695, %v2136_v16  ;;  %v1623_v62 = vmax.f32 %v1160_v37, 0.0  ;;  %v1842_v33 = vpop.f32.mrf.mxu2  ;;  %v1435_v37 = vxor.u32 %v2646_v34, %v1339_v50  ;;  %v1340_v23 = vmul.u32 2146121005, %v1308_v48 }
 0x1cb   :  { %v2771_v49 = vpop.eup %2770  ;;  %v2231_v43 = vadd.f32 1.0, %v2769_v18  ;;  %v1991_v12 = vpop.f32.mrf.mxu3  ;;  %v1843_v41 = vadd.f32 %v3484_v56, %v1842_v33  ;;  %v2616_v18 = vshrl.u32 %v1213_v30, 16 }
 0x1cc   :  { %v2267_v19 = vmul.f32 0.6931472, %v2771_v49  ;;  %2772 = vpow2.f32 %v2174_v9  ;;  %v3609_v25 = vadd.f32 %v3489_v29, %v1991_v12  ;;  %v1655_v32 = vmul.f32 2.0, %v1623_v62 }
 0x1cd   :  { %2774 = vlog2.f32 %v2231_v43  ;;  %1925 = vst.msk [vmem:[%s3955_s10 + $0x38] sm:$0xff] %vm1917_vm6, %v1843_v41  ;;  %v1562_v41 = vxor.u32 %v2677_v40, %v1466_v5  ;;  %v2647_v45 = vshrl.u32 %v1340_v23, 15 }
 0x1ce   :  { %v2326_v63 = vadd.f32 %v2267_v19, %v2070_v31  ;;  %v2105_v17 = vand.u32 2147483647, %v3609_v25  ;;  %v1687_v24 = vsel %vm1591_vm14, %v1655_v32, 0.0  ;;  %v1467_v32 = vmul.u32 2221713035, %v1435_v37 }
 0x1cf   :  { %v1162_v38 = vpop.f32.mrf.mxu1  ;;  %2706 = vmatmul.msk.f32.gmra.mxu2 %vm973_vm2, %v1687_v24  ;;  %2738 = vmatmul.msk.f32.gmra.mxu3 %vm973_vm2, %v1687_v24  ;;  %vm1594_vm3 = vcmp.ge.s32.totalorder %v1562_v41, 0  ;;  %v1436_v42 = vxor.u32 %v2647_v45, %v1340_v23 }
 0x1d0   :  { %v2358_v0 = vadd.f32 1e-06, %v2326_v63  ;;  %v2137_v47 = vsub.f32 0.0, %v2105_v17  ;;  %v1163_v51 = vadd.f32 %v3470_v60, %v1162_v38  ;;  %v1309_v63 = vxor.u32 %v2616_v18, %v1213_v30 }
 0x1d2   :  { %v2773_v3 = vpop.eup %2772  ;;  %2390 = vst.msk [vmem:[%s3956_s11 + $0x20] sm:$0xff] %vm1917_vm6, %v2358_v0  ;;  %v2176_v11 = vmul.f32 1.442695, %v2137_v47  ;;  %v1624_v46 = vmax.f32 %v1163_v51, 0.0  ;;  %v1845_v39 = vpop.f32.mrf.mxu2  ;;  %v2678_v47 = vshrl.u32 %v1467_v32, 16 }
 0x1d3   :  { %v2775_v10 = vpop.eup %2774  ;;  %v2232_v15 = vadd.f32 1.0, %v2773_v3  ;;  %v1994_v61 = vpop.f32.mrf.mxu3  ;;  %v1846_v55 = vadd.f32 %v3484_v56, %v1845_v39  ;;  %v1341_v53 = vmul.u32 2146121005, %v1309_v63  ;;  %v2073_v3 = vmax.f32 %v3609_v25, 0.0 }
 0x1d4   :  { %v2269_v57 = vmul.f32 0.6931472, %v2775_v10  ;;  %2776 = vpow2.f32 %v2176_v11  ;;  %v3628_v6 = vadd.f32 %v3489_v29, %v1994_v61  ;;  %v1656_v59 = vmul.f32 2.0, %v1624_v46 }
 0x1d5   :  { %2778 = vlog2.f32 %v2232_v15  ;;  %1926 = vst.msk [vmem:[%s3955_s10 + $0x40] sm:$0xff] %vm1917_vm6, %v1846_v55  ;;  %v2617_v15 = vshrl.u32 %v1214_v8, 16  ;;  %v2648_v5 = vshrl.u32 %v1341_v53, 15 }
 0x1d6   :  { %v2327_v14 = vadd.f32 %v2269_v57, %v2071_v54  ;;  %v2106_v27 = vand.u32 2147483647, %v3628_v6  ;;  %v1688_v1 = vsel %vm1592_vm15, %v1656_v59, 0.0  ;;  %v1563_v57 = vxor.u32 %v2678_v47, %v1467_v32 }
 0x1d7   :  { %v1165_v13 = vpop.f32.mrf.mxu1  ;;  %2707 = vmatmul.msk.f32.gmra.mxu2 %vm973_vm2, %v1688_v1  ;;  %2739 = vmatmul.msk.f32.gmra.mxu3 %vm973_vm2, %v1688_v1  ;;  %v1468_v59 = vmul.u32 2221713035, %v1436_v42  ;;  %v2074_v40 = vmax.f32 %v3628_v6, 0.0 }
 0x1d8   :  { %v2359_v28 = vadd.f32 1e-06, %v2327_v14  ;;  %v2138_v7 = vsub.f32 0.0, %v2106_v27  ;;  %v1166_v16 = vadd.f32 %v3470_v60, %v1165_v13  ;;  %v1310_v14 = vxor.u32 %v2617_v15, %v1214_v8 }
 0x1d9   :  { %vm1595_vm0 = vcmp.ge.s32.totalorder %v1563_v57, 0  ;;  %v1437_v13 = vxor.u32 %v2648_v5, %v1341_v53 }
 0x1da   :  { %v2777_v21 = vpop.eup %2776  ;;  %2391 = vst.msk [vmem:[%s3956_s11 + $0x28] sm:$0xff] %vm1917_vm6, %v2359_v28  ;;  %v2178_v4 = vmul.f32 1.442695, %v2138_v7  ;;  %v1625_v31 = vmax.f32 %v1166_v16, 0.0  ;;  %v1848_v43 = vpop.f32.mrf.mxu2  ;;  %v2679_v7 = vshrl.u32 %v1468_v59, 16 }
 0x1db   :  { %v2779_v9 = vpop.eup %2778  ;;  %v2233_v49 = vadd.f32 1.0, %v2777_v21  ;;  %v1997_v62 = vpop.f32.mrf.mxu3  ;;  %v1849_v12 = vadd.f32 %v3484_v56, %v1848_v43  ;;  %v1342_v18 = vmul.u32 2146121005, %v1310_v14 }
 0x1dc   :  { %v2271_v33 = vmul.f32 0.6931472, %v2779_v9  ;;  %2780 = vpow2.f32 %v2178_v4  ;;  %v3647_v26 = vadd.f32 %v3489_v29, %v1997_v62  ;;  %v1657_v19 = vmul.f32 2.0, %v1625_v31 }
 0x1dd   :  { %2782 = vlog2.f32 %v2233_v49  ;;  %1927 = vst.msk [vmem:[%s3955_s10 + $0x48] sm:$0xff] %vm1917_vm6, %v1849_v12  ;;  %v1564_v62 = vxor.u32 %v2679_v7, %v1468_v59 }
 0x1de   :  { %v2328_v44 = vadd.f32 %v2271_v33, %v2072_v52  ;;  %v2107_v20 = vand.u32 2147483647, %v3647_v26  ;;  %v1689_v17 = vsel %vm1593_vm1, %v1657_v19, 0.0  ;;  %v1469_v33 = vmul.u32 2221713035, %v1437_v13 }
 0x1df   :  { %v1168_v35 = vpop.f32.mrf.mxu1  ;;  %2708 = vmatmul.msk.f32.gmra.mxu2 %vm973_vm2, %v1689_v17  ;;  %2740 = vmatmul.msk.f32.gmra.mxu3 %vm973_vm2, %v1689_v17  ;;  %v2649_v19 = vshrl.u32 %v1342_v18, 15  ;;  %vm1596_vm4 = vcmp.ge.s32.totalorder %v1564_v62, 0 }
 0x1e0   :  { %v2360_v36 = vadd.f32 1e-06, %v2328_v44  ;;  %v2139_v24 = vsub.f32 0.0, %v2107_v20  ;;  %v1169_v0 = vadd.f32 %v3470_v60, %v1168_v35  ;;  %v2680_v17 = vshrl.u32 %v1469_v33, 16 }
 0x1e2   :  { %v2781_v38 = vpop.eup %2780  ;;  %2392 = vst.msk [vmem:[%s3956_s11 + $0x30] sm:$0xff] %vm1917_vm6, %v2360_v36  ;;  %v2180_v51 = vmul.f32 1.442695, %v2139_v24  ;;  %v1626_v2 = vmax.f32 %v1169_v0, 0.0  ;;  %v1851_v10 = vpop.f32.mrf.mxu2  ;;  %v2075_v36 = vmax.f32 %v3647_v26, 0.0 }
 0x1e3   :  { %v2783_v50 = vpop.eup %2782  ;;  %v2234_v11 = vadd.f32 1.0, %v2781_v38  ;;  %v2000_v54 = vpop.f32.mrf.mxu3  ;;  %v1852_v39 = vadd.f32 %v3484_v56, %v1851_v10  ;;  %v1438_v38 = vxor.u32 %v2649_v19, %v1342_v18 }
 0x1e4   :  { %v2273_v46 = vmul.f32 0.6931472, %v2783_v50  ;;  %2784 = vpow2.f32 %v2180_v51  ;;  %v3665_v61 = vadd.f32 %v3489_v29, %v2000_v54  ;;  %v1658_v58 = vmul.f32 2.0, %v1626_v2 }
 0x1e5   :  { %2786 = vlog2.f32 %v2234_v11  ;;  %1928 = vst.msk [vmem:[%s3955_s10 + $0x50] sm:$0xff] %vm1917_vm6, %v1852_v39  ;;  %v1565_v11 = vxor.u32 %v2680_v17, %v1469_v33  ;;  %v1470_v10 = vmul.u32 2221713035, %v1438_v38 }
 0x1e6   :  { %v2329_v55 = vadd.f32 %v2273_v46, %v2073_v3  ;;  %v2108_v25 = vand.u32 2147483647, %v3665_v61  ;;  %v1690_v34 = vsel %vm1594_vm3, %v1658_v58, 0.0 }
 0x1e7   :  { %v1171_v30 = vpop.f32.mrf.mxu1  ;;  %2709 = vmatmul.msk.f32.gmra.mxu2 %vm973_vm2, %v1690_v34  ;;  %2741 = vmatmul.msk.f32.gmra.mxu3 %vm973_vm2, %v1690_v34  ;;  %vm1597_vm5 = vcmp.ge.s32.totalorder %v1565_v11, 0 }
 0x1e8   :  { %v2361_v27 = vadd.f32 1e-06, %v2329_v55  ;;  %v2140_v48 = vsub.f32 0.0, %v2108_v25  ;;  %v1172_v1 = vadd.f32 %v3470_v60, %v1171_v30  ;;  %v2076_v25 = vmax.f32 %v3665_v61, 0.0 }
 0x1ea   :  { %v2785_v22 = vpop.eup %2784  ;;  %2393 = vst.msk [vmem:[%s3956_s11 + $0x38] sm:$0xff] %vm1917_vm6, %v2361_v27  ;;  %v2182_v28 = vmul.f32 1.442695, %v2140_v48  ;;  %v1627_v21 = vmax.f32 %v1172_v1, 0.0  ;;  %v1854_v4 = vpop.f32.mrf.mxu2  ;;  %v2681_v27 = vshrl.u32 %v1470_v10, 16 }
 0x1eb   :  { %v2787_v16 = vpop.eup %2786  ;;  %v2235_v37 = vadd.f32 1.0, %v2785_v22  ;;  %v2003_v23 = vpop.f32.mrf.mxu3  ;;  %v1855_v52 = vadd.f32 %v3484_v56, %v1854_v4 }
 0x1ec   :  { %v2275_v9 = vmul.f32 0.6931472, %v2787_v16  ;;  %2788 = vpow2.f32 %v2182_v28  ;;  %v3683_v49 = vadd.f32 %v3489_v29, %v2003_v23  ;;  %v1659_v31 = vmul.f32 2.0, %v1627_v21 }
 0x1ed   :  { %2790 = vlog2.f32 %v2235_v37  ;;  %1929 = vst.msk [vmem:[%s3955_s10 + $0x58] sm:$0xff] %vm1917_vm6, %v1855_v52  ;;  %v1566_v13 = vxor.u32 %v2681_v27, %v1470_v10 }
 0x1ee   :  { %v2330_v43 = vadd.f32 %v2275_v9, %v2074_v40  ;;  %v2109_v6 = vand.u32 2147483647, %v3683_v49  ;;  %v1691_v12 = vsel %vm1595_vm0, %v1659_v31, 0.0  ;;  %v2077_v9 = vmax.f32 %v3683_v49, 0.0 }
 0x1ef   :  { %v1174_v44 = vpop.f32.mrf.mxu1  ;;  %2710 = vmatmul.msk.f32.gmra.mxu2 %vm973_vm2, %v1691_v12  ;;  %2742 = vmatmul.msk.f32.gmra.mxu3 %vm973_vm2, %v1691_v12  ;;  %vm1598_vm7 = vcmp.ge.s32.totalorder %v1566_v13, 0 }
 0x1f0   :  { %v2362_v41 = vadd.f32 1e-06, %v2330_v43  ;;  %v2141_v32 = vsub.f32 0.0, %v2109_v6  ;;  %v1175_v20 = vadd.f32 %v3470_v60, %v1174_v44 }
 0x1f2   :  { %v2789_v45 = vpop.eup %2788  ;;  %2394 = vst.msk [vmem:[%s3956_s11 + $0x40] sm:$0xff] %vm1917_vm6, %v2362_v41  ;;  %v2184_v63 = vmul.f32 1.442695, %v2141_v32  ;;  %v1628_v35 = vmax.f32 %v1175_v20, 0.0  ;;  %v1857_v0 = vpop.f32.mrf.mxu2 }
 0x1f3   :  { %v2791_v8 = vpop.eup %2790  ;;  %v2236_v24 = vadd.f32 1.0, %v2789_v45  ;;  %v2006_v47 = vpop.f32.mrf.mxu3  ;;  %v1858_v42 = vadd.f32 %v3484_v56, %v1857_v0 }
 0x1f4   :  { %v2277_v51 = vmul.f32 0.6931472, %v2791_v8  ;;  %2792 = vpow2.f32 %v2184_v63  ;;  %v3701_v53 = vadd.f32 %v3489_v29, %v2006_v47  ;;  %v1660_v50 = vmul.f32 2.0, %v1628_v35 }
 0x1f5   :  { %2794 = vlog2.f32 %v2236_v24  ;;  %1930 = vst.msk [vmem:[%s3955_s10 + $0x60] sm:$0xff] %vm1917_vm6, %v1858_v42 }
 0x1f6   :  { %v2331_v3 = vadd.f32 %v2277_v51, %v2075_v36  ;;  %v2110_v26 = vand.u32 2147483647, %v3701_v53  ;;  %v1692_v2 = vsel %vm1596_vm4, %v1660_v50, 0.0  ;;  %v2078_v17 = vmax.f32 %v3701_v53, 0.0 }
 0x1f7   :  { %v1177_v46 = vpop.f32.mrf.mxu1  ;;  %2711 = vmatmul.msk.f32.gmra.mxu2 %vm973_vm2, %v1692_v2  ;;  %2743 = vmatmul.msk.f32.gmra.mxu3 %vm973_vm2, %v1692_v2 }
 0x1f8   :  { %v2363_v54 = vadd.f32 1e-06, %v2331_v3  ;;  %v2142_v15 = vsub.f32 0.0, %v2110_v26  ;;  %v1178_v39 = vadd.f32 %v3470_v60, %v1177_v46 }
 0x1fa   :  { %v2793_v58 = vpop.eup %2792  ;;  %2395 = vst.msk [vmem:[%s3956_s11 + $0x48] sm:$0xff] %vm1917_vm6, %v2363_v54  ;;  %v2186_v57 = vmul.f32 1.442695, %v2142_v15  ;;  %v1629_v5 = vmax.f32 %v1178_v39, 0.0  ;;  %v1860_v34 = vpop.f32.mrf.mxu2 }
 0x1fb   :  { %v2795_v55 = vpop.eup %2794  ;;  %v2237_v59 = vadd.f32 1.0, %v2793_v58  ;;  %v2009_v14 = vpop.f32.mrf.mxu3  ;;  %v1861_v30 = vadd.f32 %v3484_v56, %v1860_v34 }
 0x1fc   :  { %v2279_v48 = vmul.f32 0.6931472, %v2795_v55  ;;  %2796 = vpow2.f32 %v2186_v57  ;;  %v3719_v1 = vadd.f32 %v3489_v29, %v2009_v14  ;;  %v1661_v22 = vmul.f32 2.0, %v1629_v5 }
 0x1fd   :  { %2798 = vlog2.f32 %v2237_v59  ;;  %1931 = vst.msk [vmem:[%s3955_s10 + $0x68] sm:$0xff] %vm1917_vm6, %v1861_v30  ;;  %v3776_v30 = vld [vmem:[%s3953_s7] ss:$0 sm:$0xff] }
 0x1fe   :  { %v2332_v28 = vadd.f32 %v2279_v48, %v2076_v25  ;;  %v2111_v61 = vand.u32 2147483647, %v3719_v1  ;;  %v1693_v7 = vsel %vm1597_vm5, %v1661_v22, 0.0  ;;  %v2079_v11 = vmax.f32 %v3719_v1, 0.0  ;;  %v3782_v22 = vld [vmem:[%s3954_s9] ss:$0 sm:$0xff] }
 0x1ff   :  { %v1180_v37 = vpop.f32.mrf.mxu1  ;;  %2712 = vmatmul.msk.f32.gmra.mxu2 %vm973_vm2, %v1693_v7  ;;  %2744 = vmatmul.msk.f32.gmra.mxu3 %vm973_vm2, %v1693_v7 }
 0x200   :  { %v2364_v16 = vadd.f32 1e-06, %v2332_v28  ;;  %v2143_v40 = vsub.f32 0.0, %v2111_v61  ;;  %v1181_v21 = vadd.f32 %v3470_v60, %v1180_v37 }
 0x202   :  { %v2797_v4 = vpop.eup %2796  ;;  %2396 = vst.msk [vmem:[%s3956_s11 + $0x50] sm:$0xff] %vm1917_vm6, %v2364_v16  ;;  %v2188_v23 = vmul.f32 1.442695, %v2143_v40  ;;  %v1630_v31 = vmax.f32 %v1181_v21, 0.0  ;;  %v1863_v43 = vpop.f32.mrf.mxu2 }
 0x203   :  { %v2799_v18 = vpop.eup %2798  ;;  %v2238_v52 = vadd.f32 1.0, %v2797_v4  ;;  %v2012_v6 = vpop.f32.mrf.mxu3  ;;  %v1864_v33 = vadd.f32 %v3484_v56, %v1863_v43 }
 0x204   :  { %v2281_v62 = vmul.f32 0.6931472, %v2799_v18  ;;  %2800 = vpow2.f32 %v2188_v23  ;;  %v3737_v60 = vadd.f32 %v3489_v29, %v2012_v6  ;;  %v1662_v12 = vmul.f32 2.0, %v1630_v31 }
 0x205   :  { %2802 = vlog2.f32 %v2238_v52  ;;  %1932 = vst.msk [vmem:[%s3955_s10 + $0x70] sm:$0xff] %vm1917_vm6, %v1864_v33 }
 0x206   :  { %v2333_v19 = vadd.f32 %v2281_v62, %v2077_v9  ;;  %v2112_v49 = vand.u32 2147483647, %v3737_v60  ;;  %v1694_v41 = vsel %vm1598_vm7, %v1662_v12, 0.0 }
 0x207   :  { %2713 = vmatmul.msk.f32.gmra.mxu2 %vm973_vm2, %v1694_v41  ;;  %2745 = vmatmul.msk.f32.gmra.mxu3 %vm973_vm2, %v1694_v41 }
 0x208   :  { %v2365_v32 = vadd.f32 1e-06, %v2333_v19  ;;  %v2144_v44 = vsub.f32 0.0, %v2112_v49 }
 0x20a   :  { %v2801_v20 = vpop.eup %2800  ;;  %2397 = vst.msk [vmem:[%s3956_s11 + $0x58] sm:$0xff] %vm1917_vm6, %v2365_v32  ;;  %v2190_v45 = vmul.f32 1.442695, %v2144_v44  ;;  %v1866_v36 = vpop.f32.mrf.mxu2 }
 0x20b   :  { %v2803_v63 = vpop.eup %2802  ;;  %v2239_v8 = vadd.f32 1.0, %v2801_v20  ;;  %v2015_v24 = vpop.f32.mrf.mxu3  ;;  %v1867_v0 = vadd.f32 %v3484_v56, %v1866_v36 }
 0x20c   :  { %v2283_v35 = vmul.f32 0.6931472, %v2803_v63  ;;  %2804 = vpow2.f32 %v2190_v45  ;;  %v2016_v47 = vadd.f32 %v3489_v29, %v2015_v24 }
 0x20d   :  { %2806 = vlog2.f32 %v2239_v8  ;;  %1933 = vst.msk [vmem:[%s3955_s10 + $0x78] sm:$0xff] %vm1917_vm6, %v1867_v0 }
 0x20e   :  { %v2334_v38 = vadd.f32 %v2283_v35, %v2078_v17  ;;  %v2113_v51 = vand.u32 2147483647, %v2016_v47  ;;  %v2081_v4 = vmax.f32 %v2016_v47, 0.0 }
 0x210   :  { %v2366_v42 = vadd.f32 1e-06, %v2334_v38  ;;  %v2145_v50 = vsub.f32 0.0, %v2113_v51 }
 0x212   :  { %v2805_v53 = vpop.eup %2804  ;;  %2398 = vst.msk [vmem:[%s3956_s11 + $0x60] sm:$0xff] %vm1917_vm6, %v2366_v42  ;;  %v2192_v3 = vmul.f32 1.442695, %v2145_v50  ;;  %v1869_v10 = vpop.f32.mrf.mxu2 }
 0x213   :  { %v2807_v26 = vpop.eup %2806  ;;  %v2240_v2 = vadd.f32 1.0, %v2805_v53  ;;  %v2018_v54 = vpop.f32.mrf.mxu3  ;;  %v1870_v46 = vadd.f32 %v3484_v56, %v1869_v10 }
 0x214   :  { %v2285_v15 = vmul.f32 0.6931472, %v2807_v26  ;;  %2808 = vpow2.f32 %v2192_v3  ;;  %v2019_v39 = vadd.f32 %v3489_v29, %v2018_v54  ;;  %v2080_v29 = vmax.f32 %v3737_v60, 0.0 }
 0x215   :  { %2810 = vlog2.f32 %v2240_v2  ;;  %1934 = vst.msk [vmem:[%s3955_s10 + $0x80] sm:$0xff] %vm1917_vm6, %v1870_v46 }
 0x216   :  { %v2335_v58 = vadd.f32 %v2285_v15, %v2079_v11  ;;  %v2114_v57 = vand.u32 2147483647, %v2019_v39  ;;  %v2082_v41 = vmax.f32 %v2019_v39, 0.0 }
 0x218   :  { %v2367_v55 = vadd.f32 1e-06, %v2335_v58  ;;  %v2146_v25 = vsub.f32 0.0, %v2114_v57 }
 0x21a   :  { %v2809_v59 = vpop.eup %2808  ;;  %2399 = vst.msk [vmem:[%s3956_s11 + $0x68] sm:$0xff] %vm1917_vm6, %v2367_v55  ;;  %v2194_v5 = vmul.f32 1.442695, %v2146_v25  ;;  %v1872_v14 = vpop.f32.mrf.mxu2 }
 0x21b   :  { %v2811_v56 = vpop.eup %2810  ;;  %v2241_v34 = vadd.f32 1.0, %v2809_v59  ;;  %v2021_v27 = vpop.f32.mrf.mxu3  ;;  %v1873_v1 = vadd.f32 %v3776_v30, %v1872_v14 }
 0x21c   :  { %v2287_v48 = vmul.f32 0.6931472, %v2811_v56  ;;  %2812 = vpow2.f32 %v2194_v5  ;;  %v2022_v28 = vadd.f32 %v3782_v22, %v2021_v27 }
 0x21d   :  { %2814 = vlog2.f32 %v2241_v34  ;;  %1935 = vst.msk [vmem:[%s3955_s10 + $0x88] sm:$0xff] %vm1917_vm6, %v1873_v1 }
 0x21e   :  { %v2336_v61 = vadd.f32 %v2287_v48, %v2080_v29  ;;  %v2115_v7 = vand.u32 2147483647, %v2022_v28  ;;  %v2083_v51 = vmax.f32 %v2022_v28, 0.0 }
 0x220   :  { %v2368_v13 = vadd.f32 1e-06, %v2336_v61  ;;  %v2147_v16 = vsub.f32 0.0, %v2115_v7 }
 0x222   :  { %v2813_v40 = vpop.eup %2812  ;;  %2400 = vst.msk [vmem:[%s3956_s11 + $0x70] sm:$0xff] %vm1917_vm6, %v2368_v13  ;;  %v2196_v37 = vmul.f32 1.442695, %v2147_v16  ;;  %v1875_v18 = vpop.f32.mrf.mxu2 }
 0x223   :  { %v2815_v21 = vpop.eup %2814  ;;  %v2242_v23 = vadd.f32 1.0, %v2813_v40  ;;  %v2024_v9 = vpop.f32.mrf.mxu3  ;;  %v1876_v31 = vadd.f32 %v3776_v30, %v1875_v18 }
 0x224   :  { %v2289_v52 = vmul.f32 0.6931472, %v2815_v21  ;;  %2816 = vpow2.f32 %v2196_v37  ;;  %v2025_v43 = vadd.f32 %v3782_v22, %v2024_v9 }
 0x225   :  { %2818 = vlog2.f32 %v2242_v23  ;;  %1936 = vst.msk [vmem:[%s3955_s10 + $0x90] sm:$0xff] %vm1917_vm6, %v1876_v31 }
 0x226   :  { %v2337_v6 = vadd.f32 %v2289_v52, %v2081_v4  ;;  %v2116_v62 = vand.u32 2147483647, %v2025_v43  ;;  %v2084_v57 = vmax.f32 %v2025_v43, 0.0 }
 0x228   :  { %v2369_v33 = vadd.f32 1e-06, %v2337_v6  ;;  %v2148_v60 = vsub.f32 0.0, %v2116_v62 }
 0x22a   :  { %v2817_v12 = vpop.eup %2816  ;;  %2401 = vst.msk [vmem:[%s3956_s11 + $0x78] sm:$0xff] %vm1917_vm6, %v2369_v33  ;;  %v2198_v19 = vmul.f32 1.442695, %v2148_v60  ;;  %v1878_v44 = vpop.f32.mrf.mxu2 }
 0x22b   :  { %v2819_v49 = vpop.eup %2818  ;;  %v2243_v32 = vadd.f32 1.0, %v2817_v12  ;;  %v2027_v20 = vpop.f32.mrf.mxu3  ;;  %v1879_v63 = vadd.f32 %v3776_v30, %v1878_v44 }
 0x22c   :  { %v2291_v45 = vmul.f32 0.6931472, %v2819_v49  ;;  %2820 = vpow2.f32 %v2198_v19  ;;  %v2028_v17 = vadd.f32 %v3782_v22, %v2027_v20 }
 0x22d   :  { %2822 = vlog2.f32 %v2243_v32  ;;  %1937 = vst.msk [vmem:[%s3955_s10 + $0x98] sm:$0xff] %vm1917_vm6, %v1879_v63 }
 0x22e   :  { %v2338_v8 = vadd.f32 %v2291_v45, %v2082_v41  ;;  %v2117_v36 = vand.u32 2147483647, %v2028_v17  ;;  %v2085_v7 = vmax.f32 %v2028_v17, 0.0 }
 0x230   :  { %v2370_v24 = vadd.f32 1e-06, %v2338_v8  ;;  %v2149_v35 = vsub.f32 0.0, %v2117_v36 }
 0x232   :  { %v2821_v0 = vpop.eup %2820  ;;  %2402 = vst.msk [vmem:[%s3956_s11 + $0x80] sm:$0xff] %vm1917_vm6, %v2370_v24  ;;  %v2200_v47 = vmul.f32 1.442695, %v2149_v35  ;;  %v1881_v50 = vpop.f32.mrf.mxu2 }
 0x233   :  { %v2823_v38 = vpop.eup %2822  ;;  %v2244_v42 = vadd.f32 1.0, %v2821_v0  ;;  %v2030_v53 = vpop.f32.mrf.mxu3  ;;  %v1882_v26 = vadd.f32 %v3776_v30, %v1881_v50 }
 0x234   :  { %v2293_v3 = vmul.f32 0.6931472, %v2823_v38  ;;  %2824 = vpow2.f32 %v2200_v47  ;;  %v2031_v11 = vadd.f32 %v3782_v22, %v2030_v53 }
 0x235   :  { %2826 = vlog2.f32 %v2244_v42  ;;  %1938 = vst.msk [vmem:[%s3955_s10 + $0xa0] sm:$0xff] %vm1917_vm6, %v1882_v26 }
 0x236   :  { %v2339_v2 = vadd.f32 %v2293_v3, %v2083_v51  ;;  %v2118_v10 = vand.u32 2147483647, %v2031_v11  ;;  %v2086_v62 = vmax.f32 %v2031_v11, 0.0 }
 0x238   :  { %v2371_v54 = vadd.f32 1e-06, %v2339_v2  ;;  %v2150_v15 = vsub.f32 0.0, %v2118_v10 }
 0x23a   :  { %v2825_v46 = vpop.eup %2824  ;;  %2403 = vst.msk [vmem:[%s3956_s11 + $0x88] sm:$0xff] %vm1917_vm6, %v2371_v54  ;;  %v2202_v39 = vmul.f32 1.442695, %v2150_v15  ;;  %v1884_v25 = vpop.f32.mrf.mxu2 }
 0x23b   :  { %v2827_v58 = vpop.eup %2826  ;;  %v2245_v55 = vadd.f32 1.0, %v2825_v46  ;;  %v2033_v59 = vpop.f32.mrf.mxu3  ;;  %v1885_v56 = vadd.f32 %v3776_v30, %v1884_v25 }
 0x23c   :  { %v2295_v5 = vmul.f32 0.6931472, %v2827_v58  ;;  %2828 = vpow2.f32 %v2202_v39  ;;  %v2034_v29 = vadd.f32 %v3782_v22, %v2033_v59 }
 0x23d   :  { %2830 = vlog2.f32 %v2245_v55  ;;  %1939 = vst.msk [vmem:[%s3955_s10 + $0xa8] sm:$0xff] %vm1917_vm6, %v1885_v56 }
 0x23e   :  { %v2340_v34 = vadd.f32 %v2295_v5, %v2084_v57  ;;  %v2119_v14 = vand.u32 2147483647, %v2034_v29  ;;  %v2087_v36 = vmax.f32 %v2034_v29, 0.0 }
 0x240   :  { %v2372_v27 = vadd.f32 1e-06, %v2340_v34  ;;  %v2151_v48 = vsub.f32 0.0, %v2119_v14 }
 0x242   :  { %v2829_v1 = vpop.eup %2828  ;;  %2404 = vst.msk [vmem:[%s3956_s11 + $0x90] sm:$0xff] %vm1917_vm6, %v2372_v27  ;;  %v2204_v28 = vmul.f32 1.442695, %v2151_v48  ;;  %v1887_v16 = vpop.f32.mrf.mxu2 }
 0x243   :  { %v2831_v61 = vpop.eup %2830  ;;  %v2246_v13 = vadd.f32 1.0, %v2829_v1  ;;  %v2036_v40 = vpop.f32.mrf.mxu3  ;;  %v1888_v21 = vadd.f32 %v3776_v30, %v1887_v16 }
 0x244   :  { %v2297_v37 = vmul.f32 0.6931472, %v2831_v61  ;;  %2832 = vpow2.f32 %v2204_v28  ;;  %v2037_v4 = vadd.f32 %v3782_v22, %v2036_v40 }
 0x245   :  { %2834 = vlog2.f32 %v2246_v13  ;;  %1940 = vst.msk [vmem:[%s3955_s10 + $0xb0] sm:$0xff] %vm1917_vm6, %v1888_v21 }
 0x246   :  { %v2341_v23 = vadd.f32 %v2297_v37, %v2085_v7  ;;  %v2120_v18 = vand.u32 2147483647, %v2037_v4  ;;  %v2088_v10 = vmax.f32 %v2037_v4, 0.0 }
 0x248   :  { %v2373_v9 = vadd.f32 1e-06, %v2341_v23  ;;  %v2152_v52 = vsub.f32 0.0, %v2120_v18 }
 0x24a   :  { %v2833_v31 = vpop.eup %2832  ;;  %2405 = vst.msk [vmem:[%s3956_s11 + $0x98] sm:$0xff] %vm1917_vm6, %v2373_v9  ;;  %v2206_v43 = vmul.f32 1.442695, %v2152_v52  ;;  %v1890_v60 = vpop.f32.mrf.mxu2 }
 0x24b   :  { %v2835_v6 = vpop.eup %2834  ;;  %v2247_v33 = vadd.f32 1.0, %v2833_v31  ;;  %v2039_v12 = vpop.f32.mrf.mxu3  ;;  %v1891_v49 = vadd.f32 %v3776_v30, %v1890_v60 }
 0x24c   :  { %v2299_v19 = vmul.f32 0.6931472, %v2835_v6  ;;  %2836 = vpow2.f32 %v2206_v43  ;;  %v2040_v41 = vadd.f32 %v3782_v22, %v2039_v12 }
 0x24d   :  { %2838 = vlog2.f32 %v2247_v33  ;;  %1941 = vst.msk [vmem:[%s3955_s10 + $0xb8] sm:$0xff] %vm1917_vm6, %v1891_v49 }
 0x24e   :  { %v2342_v32 = vadd.f32 %v2299_v19, %v2086_v62  ;;  %v2121_v44 = vand.u32 2147483647, %v2040_v41  ;;  %v2089_v14 = vmax.f32 %v2040_v41, 0.0 }
 0x250   :  { %v2374_v20 = vadd.f32 1e-06, %v2342_v32  ;;  %v2153_v45 = vsub.f32 0.0, %v2121_v44 }
 0x252   :  { %v2837_v63 = vpop.eup %2836  ;;  %2406 = vst.msk [vmem:[%s3956_s11 + $0xa0] sm:$0xff] %vm1917_vm6, %v2374_v20  ;;  %v2208_v17 = vmul.f32 1.442695, %v2153_v45  ;;  %v1893_v35 = vpop.f32.mrf.mxu2 }
 0x253   :  { %v2839_v8 = vpop.eup %2838  ;;  %v2248_v24 = vadd.f32 1.0, %v2837_v63  ;;  %v2042_v0 = vpop.f32.mrf.mxu3  ;;  %v1894_v38 = vadd.f32 %v3776_v30, %v1893_v35 }
 0x254   :  { %v2301_v47 = vmul.f32 0.6931472, %v2839_v8  ;;  %2840 = vpow2.f32 %v2208_v17  ;;  %v2043_v51 = vadd.f32 %v3782_v22, %v2042_v0 }
 0x255   :  { %2842 = vlog2.f32 %v2248_v24  ;;  %1942 = vst.msk [vmem:[%s3955_s10 + $0xc0] sm:$0xff] %vm1917_vm6, %v1894_v38 }
 0x256   :  { %v2343_v42 = vadd.f32 %v2301_v47, %v2087_v36  ;;  %v2122_v50 = vand.u32 2147483647, %v2043_v51  ;;  %v2090_v18 = vmax.f32 %v2043_v51, 0.0 }
 0x258   :  { %v2375_v53 = vadd.f32 1e-06, %v2343_v42  ;;  %v2154_v3 = vsub.f32 0.0, %v2122_v50 }
 0x25a   :  { %v2841_v26 = vpop.eup %2840  ;;  %2407 = vst.msk [vmem:[%s3956_s11 + $0xa8] sm:$0xff] %vm1917_vm6, %v2375_v53  ;;  %v2210_v11 = vmul.f32 1.442695, %v2154_v3  ;;  %v1896_v15 = vpop.f32.mrf.mxu2 }
 0x25b   :  { %v2843_v2 = vpop.eup %2842  ;;  %v2249_v54 = vadd.f32 1.0, %v2841_v26  ;;  %v2045_v46 = vpop.f32.mrf.mxu3  ;;  %v1897_v58 = vadd.f32 %v3776_v30, %v1896_v15 }
 0x25c   :  { %v2303_v39 = vmul.f32 0.6931472, %v2843_v2  ;;  %2844 = vpow2.f32 %v2210_v11  ;;  %v2046_v57 = vadd.f32 %v3782_v22, %v2045_v46 }
 0x25d   :  { %2846 = vlog2.f32 %v2249_v54  ;;  %1943 = vst.msk [vmem:[%s3955_s10 + $0xc8] sm:$0xff] %vm1917_vm6, %v1897_v58 }
 0x25e   :  { %v2344_v55 = vadd.f32 %v2303_v39, %v2088_v10  ;;  %v2123_v25 = vand.u32 2147483647, %v2046_v57  ;;  %v2091_v44 = vmax.f32 %v2046_v57, 0.0 }
 0x260   :  { %v2376_v59 = vadd.f32 1e-06, %v2344_v55  ;;  %v2155_v5 = vsub.f32 0.0, %v2123_v25 }
 0x262   :  { %v2845_v56 = vpop.eup %2844  ;;  %2408 = vst.msk [vmem:[%s3956_s11 + $0xb0] sm:$0xff] %vm1917_vm6, %v2376_v59  ;;  %v2212_v29 = vmul.f32 1.442695, %v2155_v5  ;;  %v1899_v48 = vpop.f32.mrf.mxu2 }
 0x263   :  { %v2847_v34 = vpop.eup %2846  ;;  %v2250_v27 = vadd.f32 1.0, %v2845_v56  ;;  %v2048_v1 = vpop.f32.mrf.mxu3  ;;  %v1900_v61 = vadd.f32 %v3776_v30, %v1899_v48 }
 0x264   :  { %v2305_v28 = vmul.f32 0.6931472, %v2847_v34  ;;  %2848 = vpow2.f32 %v2212_v29  ;;  %v2049_v7 = vadd.f32 %v3782_v22, %v2048_v1 }
 0x265   :  { %2850 = vlog2.f32 %v2250_v27  ;;  %1944 = vst.msk [vmem:[%s3955_s10 + $0xd0] sm:$0xff] %vm1917_vm6, %v1900_v61 }
 0x266   :  { %v2345_v13 = vadd.f32 %v2305_v28, %v2089_v14  ;;  %v2124_v16 = vand.u32 2147483647, %v2049_v7  ;;  %v2092_v50 = vmax.f32 %v2049_v7, 0.0 }
 0x268   :  { %v2377_v40 = vadd.f32 1e-06, %v2345_v13  ;;  %v2156_v37 = vsub.f32 0.0, %v2124_v16 }
 0x26a   :  { %v2849_v21 = vpop.eup %2848  ;;  %2409 = vst.msk [vmem:[%s3956_s11 + $0xb8] sm:$0xff] %vm1917_vm6, %v2377_v40  ;;  %v2214_v4 = vmul.f32 1.442695, %v2156_v37  ;;  %v1902_v52 = vpop.f32.mrf.mxu2 }
 0x26b   :  { %v2851_v23 = vpop.eup %2850  ;;  %v2251_v9 = vadd.f32 1.0, %v2849_v21  ;;  %v2051_v31 = vpop.f32.mrf.mxu3  ;;  %v1903_v6 = vadd.f32 %v3776_v30, %v1902_v52 }
 0x26c   :  { %v2307_v43 = vmul.f32 0.6931472, %v2851_v23  ;;  %2852 = vpow2.f32 %v2214_v4  ;;  %v2052_v62 = vadd.f32 %v3782_v22, %v2051_v31 }
 0x26d   :  { %2854 = vlog2.f32 %v2251_v9  ;;  %1945 = vst.msk [vmem:[%s3955_s10 + $0xd8] sm:$0xff] %vm1917_vm6, %v1903_v6 }
 0x26e   :  { %v2346_v33 = vadd.f32 %v2307_v43, %v2090_v18  ;;  %v2125_v60 = vand.u32 2147483647, %v2052_v62  ;;  %v2093_v25 = vmax.f32 %v2052_v62, 0.0 }
 0x270   :  { %v2378_v12 = vadd.f32 1e-06, %v2346_v33  ;;  %v2157_v19 = vsub.f32 0.0, %v2125_v60 }
 0x272   :  { %v2853_v49 = vpop.eup %2852  ;;  %2410 = vst.msk [vmem:[%s3956_s11 + $0xc0] sm:$0xff] %vm1917_vm6, %v2378_v12  ;;  %v2216_v41 = vmul.f32 1.442695, %v2157_v19  ;;  %v1905_v45 = vpop.f32.mrf.mxu2 }
 0x273   :  { %v2855_v32 = vpop.eup %2854  ;;  %v2252_v20 = vadd.f32 1.0, %v2853_v49  ;;  %v2054_v63 = vpop.f32.mrf.mxu3  ;;  %v1906_v8 = vadd.f32 %v3776_v30, %v1905_v45 }
 0x274   :  { %v2309_v17 = vmul.f32 0.6931472, %v2855_v32  ;;  %2856 = vpow2.f32 %v2216_v41  ;;  %v2055_v36 = vadd.f32 %v3782_v22, %v2054_v63 }
 0x275   :  { %2858 = vlog2.f32 %v2252_v20  ;;  %1946 = vst.msk [vmem:[%s3955_s10 + $0xe0] sm:$0xff] %vm1917_vm6, %v1906_v8 }
 0x276   :  { %v2347_v24 = vadd.f32 %v2309_v17, %v2091_v44  ;;  %v2126_v35 = vand.u32 2147483647, %v2055_v36  ;;  %v2094_v16 = vmax.f32 %v2055_v36, 0.0 }
 0x278   :  { %v2379_v0 = vadd.f32 1e-06, %v2347_v24  ;;  %v2158_v47 = vsub.f32 0.0, %v2126_v35 }
 0x27a   :  { %v2857_v38 = vpop.eup %2856  ;;  %2411 = vst.msk [vmem:[%s3956_s11 + $0xc8] sm:$0xff] %vm1917_vm6, %v2379_v0  ;;  %v2218_v51 = vmul.f32 1.442695, %v2158_v47  ;;  %v1908_v3 = vpop.f32.mrf.mxu2 }
 0x27b   :  { %v2859_v42 = vpop.eup %2858  ;;  %v2253_v53 = vadd.f32 1.0, %v2857_v38  ;;  %v2057_v26 = vpop.f32.mrf.mxu3  ;;  %v1909_v2 = vadd.f32 %v3776_v30, %v1908_v3 }
 0x27c   :  { %v2311_v11 = vmul.f32 0.6931472, %v2859_v42  ;;  %2860 = vpow2.f32 %v2218_v51  ;;  %v2058_v10 = vadd.f32 %v3782_v22, %v2057_v26 }
 0x27d   :  { %2862 = vlog2.f32 %v2253_v53  ;;  %1947 = vst.msk [vmem:[%s3955_s10 + $0xe8] sm:$0xff] %vm1917_vm6, %v1909_v2 }
 0x27e   :  { %v2348_v54 = vadd.f32 %v2311_v11, %v2092_v50  ;;  %v2127_v15 = vand.u32 2147483647, %v2058_v10 }
 0x280   :  { %v2380_v46 = vadd.f32 1e-06, %v2348_v54  ;;  %v2159_v39 = vsub.f32 0.0, %v2127_v15 }
 0x282   :  { %v2861_v58 = vpop.eup %2860  ;;  %2412 = vst.msk [vmem:[%s3956_s11 + $0xd0] sm:$0xff] %vm1917_vm6, %v2380_v46  ;;  %v2220_v57 = vmul.f32 1.442695, %v2159_v39  ;;  %v1911_v5 = vpop.f32.mrf.mxu2 }
 0x283   :  { %v2863_v55 = vpop.eup %2862  ;;  %v2254_v59 = vadd.f32 1.0, %v2861_v58  ;;  %v2060_v56 = vpop.f32.mrf.mxu3  ;;  %v1912_v34 = vadd.f32 %v3776_v30, %v1911_v5 }
 0x284   :  { %v2313_v29 = vmul.f32 0.6931472, %v2863_v55  ;;  %2864 = vpow2.f32 %v2220_v57  ;;  %v2061_v14 = vadd.f32 %v3782_v22, %v2060_v56 }
 0x285   :  { %2866 = vlog2.f32 %v2254_v59  ;;  %1948 = vst.msk [vmem:[%s3955_s10 + $0xf0] sm:$0xff] %vm1917_vm6, %v1912_v34 }
 0x286   :  { %v2349_v27 = vadd.f32 %v2313_v29, %v2093_v25  ;;  %v2128_v48 = vand.u32 2147483647, %v2061_v14  ;;  %v2096_v44 = vmax.f32 %v2061_v14, 0.0 }
 0x288   :  { %v2381_v1 = vadd.f32 1e-06, %v2349_v27  ;;  %v2160_v28 = vsub.f32 0.0, %v2128_v48 }
 0x28a   :  { %v2865_v61 = vpop.eup %2864  ;;  %2413 = vst.msk [vmem:[%s3956_s11 + $0xd8] sm:$0xff] %vm1917_vm6, %v2381_v1  ;;  %v2222_v7 = vmul.f32 1.442695, %v2160_v28  ;;  %v1914_v37 = vpop.f32.mrf.mxu2 }
 0x28b   :  { %v2867_v13 = vpop.eup %2866  ;;  %v2255_v40 = vadd.f32 1.0, %v2865_v61  ;;  %v2063_v21 = vpop.f32.mrf.mxu3  ;;  %v1915_v23 = vadd.f32 %v3776_v30, %v1914_v37 }
 0x28c   :  { %v2315_v4 = vmul.f32 0.6931472, %v2867_v13  ;;  %2868 = vpow2.f32 %v2222_v7  ;;  %v2064_v18 = vadd.f32 %v3782_v22, %v2063_v21  ;;  %v2095_v22 = vmax.f32 %v2058_v10, 0.0 }
 0x28d   :  { %2870 = vlog2.f32 %v2255_v40  ;;  %1949 = vst.msk [vmem:[%s3955_s10 + $0xf8] sm:$0xff] %vm1917_vm6, %v1915_v23 }
 0x28e   :  { %v2350_v9 = vadd.f32 %v2315_v4, %v2094_v16  ;;  %v2129_v52 = vand.u32 2147483647, %v2064_v18  ;;  %v2097_v8 = vmax.f32 %v2064_v18, 0.0 }
 0x290   :  { %v2382_v31 = vadd.f32 1e-06, %v2350_v9  ;;  %v2161_v43 = vsub.f32 0.0, %v2129_v52 }
 0x292   :  { %v2869_v6 = vpop.eup %2868  ;;  %2414 = vst.msk [vmem:[%s3956_s11 + $0xe0] sm:$0xff] %vm1917_vm6, %v2382_v31  ;;  %v2224_v62 = vmul.f32 1.442695, %v2161_v43 }
 0x293   :  { %v2871_v30 = vpop.eup %2870  ;;  %v2256_v33 = vadd.f32 1.0, %v2869_v6 }
 0x294   :  { %v2317_v60 = vmul.f32 0.6931472, %v2871_v30  ;;  %2872 = vpow2.f32 %v2224_v62 }
 0x295   :  { %2874 = vlog2.f32 %v2256_v33 }
 0x296   :  { %v2351_v12 = vadd.f32 %v2317_v60, %v2095_v22 }
 0x298   :  { %v2383_v19 = vadd.f32 1e-06, %v2351_v12 }
 0x29a   :  { %v2873_v49 = vpop.eup %2872  ;;  %2415 = vst.msk [vmem:[%s3956_s11 + $0xe8] sm:$0xff] %vm1917_vm6, %v2383_v19 }
 0x29b   :  { %v2875_v41 = vpop.eup %2874  ;;  %v2257_v32 = vadd.f32 1.0, %v2873_v49 }
 0x29c   :  { %v2319_v20 = vmul.f32 0.6931472, %v2875_v41 }
 0x29d   :  { %2876 = vlog2.f32 %v2257_v32 }
 0x29e   :  { %v2352_v45 = vadd.f32 %v2319_v20, %v2096_v44 }
 0x2a0   :  { %v2384_v63 = vadd.f32 1e-06, %v2352_v45 }
 0x2a2   :  { %2416 = vst.msk [vmem:[%s3956_s11 + $0xf0] sm:$0xff] %vm1917_vm6, %v2384_v63 }
 0x2a3   :  { %v2877_v17 = vpop.eup %2876 }
 0x2a4   :  { %v2321_v36 = vmul.f32 0.6931472, %v2877_v17 }
 0x2a6   :  { %v2353_v24 = vadd.f32 %v2321_v36, %v2097_v8 }
 0x2a8   :  { %v2385_v35 = vadd.f32 1e-06, %v2353_v24 }
 0x2aa   :  { %2417 = vst.msk [vmem:[%s3956_s11 + $0xf8] sm:$0xff] %vm1917_vm6, %v2385_v35 }

</bundles_post_ra>
